<compile_context>
chip_gen: v6e
topology: v6e:2x2x1
jax: 0.10.0
libtpu: 0.0.40
codegen_flags: <defaults>
</compile_context>

<pallas_src>
import functools

import jax
import jax.numpy as jnp
from jax.experimental import pallas as pl
from jax.experimental.pallas import tpu as pltpu


# --------------------------------------------------------------------------- #
# small helpers
# --------------------------------------------------------------------------- #

def _vmem_capacity_bytes():
    try:
        cap = getattr(pltpu.get_tpu_info(), "vmem_capacity_bytes", None)
        if cap:
            return int(cap)
    except Exception:
        pass
    return 64 << 20  # conservative default (v7x per-TensorCore VMEM)


def _pick_vmem_limit(need_bytes):
    budget = int(0.75 * _vmem_capacity_bytes())   # ~48 MiB v7x, ~96 MiB v5e/v6e
    return max(4 << 20, min(int(1.35 * need_bytes), budget))


def _block_spec(block_shape, index_map, *, single_buffer=False):
    """BlockSpec; single-buffer constant-index blocks when supported."""
    if single_buffer:
        try:
            return pl.BlockSpec(block_shape, index_map,
                                pipeline_mode=pl.Buffered(1))
        except TypeError:  # Pallas without pipeline_mode kwarg
            pass
    return pl.BlockSpec(block_shape, index_map)


# --------------------------------------------------------------------------- #
# kernels
# --------------------------------------------------------------------------- #

def _downsample_conv_kernel(xph_ref, w_ref, b_ref, o_ref, *, wo):
    """3x3 / stride-2 / pad-1 conv, rebuilt from the four stride-2 phases.

    xph_ref: (1, 4, C, To)  phase p = 2*py+px; lane axis = flattened output pixels
    w_ref:   (9, Cb, C)     w9[3*dy + dx] = torch_weight[:, :, dy, dx]
    b_ref:   (Cb, 1)        f32 bias
    o_ref:   (1, Cb, To)
    """
    c_in = xph_ref.shape[2]
    to = xph_ref.shape[3]
    cb = o_ref.shape[1]
    cdt = xph_ref.dtype

    # Mask for taps looking one column left: output col 0 reads the zero pad.
    col_ok = (jax.lax.broadcasted_iota(jnp.int32, (1, to), 1) % wo >= 1)
    col_ok = col_ok.astype(cdt)

    acc = jnp.zeros((cb, to), jnp.float32)
    for dy in range(3):
        py, doh = ((1, 1), (0, 0), (1, 0))[dy]       # phase-row, row shift
        for dx in range(3):
            px, dow = ((1, 1), (0, 0), (1, 0))[dx]   # phase-col, col shift
            base = xph_ref[0, 2 * py + px]            # (C, To)
            shift = doh * wo + dow
            if shift == 0:
                tap = base
            elif shift >= to:
                tap = jnp.zeros((c_in, to), cdt)
            else:
                # shift along the flattened pixel (lane) axis, zero-filled
                tap = jnp.concatenate(
                    [jnp.zeros((c_in, shift), cdt), base[:, :to - shift]],
                    axis=1)
            if dow:
                tap = tap * col_ok
            acc = acc + jnp.dot(w_ref[3 * dy + dx], tap,
                                preferred_element_type=jnp.float32)
    o_ref[0] = (acc + b_ref[...]).astype(o_ref.dtype)


def _downsample_pool_kernel(x2_ref, s_ref, o_ref):
    """2x2 / stride-2 average pool.

    x2_ref: (1, Rb, 2*W)  rows 2i and 2i+1 concatenated along lanes
    s_ref:  (W, Wo)       exact one-hot column-pair-sum matrix
    o_ref:  (1, Rb, Wo)
    """
    w = s_ref.shape[0]
    xb = x2_ref[0]
    rows = (xb[:, :w] + xb[:, w:]).astype(jnp.float32)          # (Rb, W)
    pooled = jnp.dot(rows, s_ref[...],
                     preferred_element_type=jnp.float32,
                     precision=jax.lax.Precision.HIGHEST)       # exact 0/1 sums
    o_ref[0] = (0.25 * pooled).astype(o_ref.dtype)


# --------------------------------------------------------------------------- #
# wrappers
# --------------------------------------------------------------------------- #

def _downsample_conv(x, params, compute_dtype):
    B, C, H, W = x.shape
    Ho, Wo = H // 2, W // 2
    To = Ho * Wo

    cdt = compute_dtype
    if cdt is None:
        # Documented choice: bf16 matmul inputs (f32 accumulation) when x is f32.
        cdt = jnp.bfloat16 if x.dtype == jnp.dtype(jnp.float32) else x.dtype
    cdt = jnp.dtype(cdt)

    # 4-phase pixel unshuffle -- the only HBM-materializing prep (1.0x of x,
    # 0.5x when cast to bf16):  xph[b, 2py+px, c, oh*Wo+ow] = x[b, c, 2oh+py, 2ow+px]
    xr = x.reshape(B, C, Ho, 2, Wo, 2)
    xph = jnp.transpose(xr, (0, 3, 5, 1, 2, 4)).reshape(B, 4, C, To).astype(cdt)

    w9 = jnp.transpose(params["w"], (2, 3, 0, 1)).reshape(9, C, C).astype(cdt)
    bias = params["b"].astype(jnp.float32).reshape(C, 1)

    # When B == 1, split output channels so both v7x TensorCores get work.
    nco = 2 if (B == 1 and C % 16 == 0) else 1
    cb = C // nco
    grid = (B, nco)

    cbytes = cdt.itemsize
    obytes = jnp.dtype(x.dtype).itemsize
    need = (2 * 4 * C * To * cbytes                       # phase block (x2 buffers)
            + (1 if nco == 1 else 2) * 9 * cb * C * cbytes
            + 2 * cb * To * obytes                        # output block
            + cb * To * 4                                 # f32 accumulator
            + 3 * C * To * cbytes                         # tap temporaries
            + 4 * To + 64 * cb)
    cp = pltpu.CompilerParams(
        dimension_semantics=("parallel", "parallel"),
        vmem_limit_bytes=_pick_vmem_limit(need))
    ce = pl.CostEstimate(
        flops=int(2 * 9 * C * C * To * B),
        transcendentals=0,
        bytes_accessed=int(xph.size * cbytes + w9.size * cbytes
                           + bias.size * 4 + B * C * To * obytes))

    kernel = functools.partial(_downsample_conv_kernel, wo=Wo)
    out_shape = jax.ShapeDtypeStruct((B, C, To), x.dtype)
    out_specs = pl.BlockSpec((1, cb, To), lambda b, j: (b, j, 0))

    def run(single_buffer):
        in_specs = [
            pl.BlockSpec((1, 4, C, To), lambda b, j: (b, 0, 0, 0)),
            _block_spec((9, cb, C), lambda b, j: (0, j, 0),
                        single_buffer=single_buffer and nco == 1),
            _block_spec((cb, 1), lambda b, j: (j, 0),
                        single_buffer=single_buffer and nco == 1),
        ]
        return pl.pallas_call(kernel, out_shape=out_shape, grid=grid,
                              in_specs=in_specs, out_specs=out_specs,
                              compiler_params=cp, cost_estimate=ce)(xph, w9, bias)

    try:
        out = run(True)
    except Exception:      # fall back to default double-buffered weight blocks
        out = run(False)
    return out.reshape(B, C, Ho, Wo)


def _downsample_pool(x):
    B, C, H, W = x.shape
    Ho, Wo = H // 2, W // 2
    R = C * Ho

    # Free (metadata-only) reshape: rows 2i and 2i+1 sit side by side on lanes.
    x2 = x.reshape(B, R, 2 * W)
    ssum = (jnp.arange(W)[:, None] // 2 ==
            jnp.arange(Wo)[None, :]).astype(jnp.float32)        # (W, Wo) one-hot

    nr = 2 if (B == 1 and R % 16 == 0) else 1   # keep both v7x cores busy at B==1
    rb = R // nr
    grid = (B, nr)

    xb = jnp.dtype(x.dtype).itemsize
    need = (2 * rb * 2 * W * xb + 2 * rb * Wo * xb
            + W * Wo * 4 + rb * W * 4 + rb * Wo * 4)
    cp = pltpu.CompilerParams(
        dimension_semantics=("parallel", "parallel"),
        vmem_limit_bytes=_pick_vmem_limit(need))
    ce = pl.CostEstimate(
        flops=int(B * (R * W + 2 * R * W * Wo)),
        transcendentals=0,
        bytes_accessed=int(x.size * xb + B * R * Wo * xb + W * Wo * 4))

    out_shape = jax.ShapeDtypeStruct((B, R, Wo), x.dtype)
    out_specs = pl.BlockSpec((1, rb, Wo), lambda b, r: (b, r, 0))

    def run(single_buffer):
        in_specs = [
            pl.BlockSpec((1, rb, 2 * W), lambda b, r: (b, r, 0)),
            _block_spec((W, Wo), lambda b, r: (0, 0),
                        single_buffer=single_buffer),
        ]
        return pl.pallas_call(_downsample_pool_kernel, out_shape=out_shape,
                              grid=grid, in_specs=in_specs, out_specs=out_specs,
                              compiler_params=cp, cost_estimate=ce)(x2, ssum)

    try:
        out = run(True)
    except Exception:
        out = run(False)
    return out.reshape(B, C, Ho, Wo)


def downsample(x, params=None, *, use_conv=True, dims=2, compute_dtype=None):
    """Forward pass of Downsample (dims=2).  x: (B, C, H, W)."""
    if dims != 2:
        # TODO(synk): dims=1 and dims=3 (stride (1, 2, 2)) variants not implemented.
        raise NotImplementedError("only dims=2 is implemented")
    B, C, H, W = x.shape
    if H % 2 or W % 2:
        # TODO(synk): odd spatial sizes (partial windows) not implemented.
        raise NotImplementedError("H and W must be even")
    if use_conv:
        if params is None:
            raise ValueError("use_conv=True requires params={'w', 'b'}")
        return _downsample_conv(x, params, compute_dtype)
    return _downsample_pool(x)


# --------------------------------------------------------------------------- #
# pure-JAX reference (mirrors the PyTorch forward pass, dims=2)
# --------------------------------------------------------------------------- #

def downsample_reference(x, params=None, *, use_conv=True):
    if use_conv:
        out = jax.lax.conv_general_dilated(
            x.astype(jnp.float32), params["w"].astype(jnp.float32),
            window_strides=(2, 2), padding=((1, 1), (1, 1)),
            dimension_numbers=("NCHW", "OIHW", "NCHW"))
        return out + params["b"].astype(jnp.float32)[None, :, None, None]
    B, C, H, W = x.shape
    return x.reshape(B, C, H // 2, 2, W // 2, 2).mean(axis=(3, 5))


# --------------------------------------------------------------------------- #
# test
# --------------------------------------------------------------------------- #

if __name__ == "__main__":
    B, C, H, W = 2, 32, 16, 16
    key = jax.random.PRNGKey(0)
    kx, kw, kb = jax.random.split(key, 3)
    x = jax.random.normal(kx, (B, C, H, W), dtype=jnp.float32)
    params = {
        "w": 0.1 * jax.random.normal(kw, (C, C, 3, 3), jnp.float32),
        "b": 0.1 * jax.random.normal(kb, (C,), jnp.float32),
    }

    # Conv path: Conv2d(C, C, 3, stride=2, padding=1); bf16 matmul, f32 accumulate.
    out_conv = jax.block_until_ready(downsample(x, params, use_conv=True))
    ref_conv = downsample_reference(x, params, use_conv=True)
    assert out_conv.shape == (B, C, H // 2, W // 2)
    err = float(jnp.max(jnp.abs(out_conv - ref_conv)))
    assert err < 5e-2, f"conv path max abs err {err}"

    # B == 1 exercises the output-channel-split (dual TensorCore) grid.
    out_conv1 = jax.block_until_ready(downsample(x[:1], params, use_conv=True))
    ref_conv1 = downsample_reference(x[:1], params, use_conv=True)
    assert out_conv1.shape == (1, C, H // 2, W // 2)
    err1 = float(jnp.max(jnp.abs(out_conv1 - ref_conv1)))
    assert err1 < 5e-2, f"conv path (B=1) max abs err {err1}"

    # Pool path: AvgPool2d(kernel_size=2, stride=2).
    out_pool = jax.block_until_ready(downsample(x, use_conv=False))
    ref_pool = downsample_reference(x, use_conv=False)
    assert out_pool.shape == (B, C, H // 2, W // 2)
    perr = float(jnp.max(jnp.abs(out_pool - ref_pool)))
    assert perr < 1e-3, f"pool path max abs err {perr}"

    print("KERNEL_OK")
</pallas_src>

<mosaic_0001>
module attributes {stable_mosaic.version = 11 : i64} {
  func.func @_downsample_conv_kernel(%arg0: i32, %arg1: i32, %arg2: memref<1x4x32x64xbf16, #tpu.memory_space<vmem>>, %arg3: memref<9x32x32xbf16, #tpu.memory_space<vmem>>, %arg4: memref<32x1xf32, #tpu.memory_space<vmem>>, %arg5: memref<1x32x64xf32, #tpu.memory_space<vmem>>) attributes {dimension_semantics = [#tpu.dimension_semantics<parallel>, #tpu.dimension_semantics<parallel>], iteration_bounds = array<i64: 2, 1>, scalar_prefetch = 0 : i64, scratch_operands = 0 : i64, tpu.core_type = #tpu.core_type<tc>, window_params = [{transform_indices = @transform_0, window_bounds = array<i64: 1, 4, 32, 64>}, {pipeline_mode = #tpu.pipeline_mode<synchronous>, transform_indices = @transform_1, window_bounds = array<i64: 9, 32, 32>}, {pipeline_mode = #tpu.pipeline_mode<synchronous>, transform_indices = @transform_2, window_bounds = array<i64: 32, 1>}, {transform_indices = @transform_3, window_bounds = array<i64: 1, 32, 64>}]} {
    %0 = tpu.iota {dimensions = array<i32: 1>} : vector<1x64xi32>
    %c8_i32 = arith.constant 8 : i32
    %c0_i32 = arith.constant 0 : i32
    %1 = arith.cmpi eq, %c8_i32, %c0_i32 : i32
    %c1_i32 = arith.constant 1 : i32
    %2 = arith.select %1, %c1_i32, %c8_i32 : i32
    %3 = vector.broadcast %2 : i32 to vector<1x64xi32>
    %4 = arith.remsi %0, %3 : vector<1x64xi32>
    %c0_i32_0 = arith.constant 0 : i32
    %5 = vector.broadcast %c0_i32_0 : i32 to vector<1x64xi32>
    %6 = arith.cmpi ne, %4, %5 : vector<1x64xi32>
    %c0_i32_1 = arith.constant 0 : i32
    %7 = vector.broadcast %c0_i32_1 : i32 to vector<1x64xi32>
    %8 = arith.cmpi slt, %4, %7 : vector<1x64xi32>
    %c0_i32_2 = arith.constant 0 : i32
    %9 = arith.cmpi slt, %2, %c0_i32_2 : i32
    %10 = vector.broadcast %9 : i1 to vector<1x64xi1>
    %11 = vector.broadcast %10 : vector<1x64xi1> to vector<1x64xi1>
    %12 = arith.xori %8, %11 : vector<1x64xi1>
    %13 = arith.andi %12, %6 : vector<1x64xi1>
    %14 = vector.broadcast %2 : i32 to vector<1x64xi32>
    %15 = arith.addi %4, %14 : vector<1x64xi32>
    %16 = arith.select %13, %15, %4 : vector<1x64xi1>, vector<1x64xi32>
    %c1_i32_3 = arith.constant 1 : i32
    %17 = vector.broadcast %c1_i32_3 : i32 to vector<1x64xi32>
    %18 = arith.cmpi sge, %16, %17 : vector<1x64xi32>
    %19 = arith.extui %18 : vector<1x64xi1> to vector<1x64xi32>
    %20 = arith.sitofp %19 : vector<1x64xi32> to vector<1x64xf32>
    %21 = arith.truncf %20 : vector<1x64xf32> to vector<1x64xbf16>
    %cst = arith.constant 0.000000e+00 : f32
    %22 = vector.broadcast %cst : f32 to vector<32x64xf32>
    %c0 = arith.constant 0 : index
    %c3 = arith.constant 3 : index
    %c0_4 = arith.constant 0 : index
    %c0_5 = arith.constant 0 : index
    %23 = vector.load %arg2[%c0, %c3, %c0_4, %c0_5] : memref<1x4x32x64xbf16, #tpu.memory_space<vmem>>, vector<1x1x32x64xbf16>
    %24 = vector.shape_cast %23 : vector<1x1x32x64xbf16> to vector<32x64xbf16>
    %cst_6 = arith.constant 0.000000e+00 : bf16
    %25 = vector.broadcast %cst_6 : bf16 to vector<32x9xbf16>
    %26 = vector.extract_strided_slice %24 {offsets = [0, 0], sizes = [32, 55], strides = [1, 1]} : vector<32x64xbf16> to vector<32x55xbf16>
    %27 = tpu.concatenate %25, %26 in 1 : vector<32x9xbf16>, vector<32x55xbf16> -> vector<32x64xbf16>
    %28 = vector.broadcast %21 : vector<1x64xbf16> to vector<32x64xbf16>
    %29 = arith.mulf %27, %28 : vector<32x64xbf16>
    %c0_7 = arith.constant 0 : index
    %c0_8 = arith.constant 0 : index
    %c0_9 = arith.constant 0 : index
    %30 = vector.load %arg3[%c0_7, %c0_8, %c0_9] : memref<9x32x32xbf16, #tpu.memory_space<vmem>>, vector<1x32x32xbf16>
    %31 = vector.shape_cast %30 : vector<1x32x32xbf16> to vector<32x32xbf16>
    %cst_10 = arith.constant dense<0.000000e+00> : vector<32x64xf32>
    %32 = tpu.matmul %31, %29, %cst_10 {dimension_numbers = #tpu.dot_dimension_numbers<[1], [0], [0], [1], [0, 0, 1, 1], [], []>} : vector<32x32xbf16>, vector<32x64xbf16>, vector<32x64xf32> -> vector<32x64xf32>
    %33 = arith.addf %22, %32 : vector<32x64xf32>
    %c0_11 = arith.constant 0 : index
    %c2 = arith.constant 2 : index
    %c0_12 = arith.constant 0 : index
    %c0_13 = arith.constant 0 : index
    %34 = vector.load %arg2[%c0_11, %c2, %c0_12, %c0_13] : memref<1x4x32x64xbf16, #tpu.memory_space<vmem>>, vector<1x1x32x64xbf16>
    %35 = vector.shape_cast %34 : vector<1x1x32x64xbf16> to vector<32x64xbf16>
    %cst_14 = arith.constant 0.000000e+00 : bf16
    %36 = vector.broadcast %cst_14 : bf16 to vector<32x8xbf16>
    %37 = vector.extract_strided_slice %35 {offsets = [0, 0], sizes = [32, 56], strides = [1, 1]} : vector<32x64xbf16> to vector<32x56xbf16>
    %38 = tpu.concatenate %36, %37 in 1 : vector<32x8xbf16>, vector<32x56xbf16> -> vector<32x64xbf16>
    %c1 = arith.constant 1 : index
    %c0_15 = arith.constant 0 : index
    %c0_16 = arith.constant 0 : index
    %39 = vector.load %arg3[%c1, %c0_15, %c0_16] : memref<9x32x32xbf16, #tpu.memory_space<vmem>>, vector<1x32x32xbf16>
    %40 = vector.shape_cast %39 : vector<1x32x32xbf16> to vector<32x32xbf16>
    %cst_17 = arith.constant dense<0.000000e+00> : vector<32x64xf32>
    %41 = tpu.matmul %40, %38, %cst_17 {dimension_numbers = #tpu.dot_dimension_numbers<[1], [0], [0], [1], [0, 0, 1, 1], [], []>} : vector<32x32xbf16>, vector<32x64xbf16>, vector<32x64xf32> -> vector<32x64xf32>
    %42 = arith.addf %33, %41 : vector<32x64xf32>
    %c0_18 = arith.constant 0 : index
    %c3_19 = arith.constant 3 : index
    %c0_20 = arith.constant 0 : index
    %c0_21 = arith.constant 0 : index
    %43 = vector.load %arg2[%c0_18, %c3_19, %c0_20, %c0_21] : memref<1x4x32x64xbf16, #tpu.memory_space<vmem>>, vector<1x1x32x64xbf16>
    %44 = vector.shape_cast %43 : vector<1x1x32x64xbf16> to vector<32x64xbf16>
    %cst_22 = arith.constant 0.000000e+00 : bf16
    %45 = vector.broadcast %cst_22 : bf16 to vector<32x8xbf16>
    %46 = vector.extract_strided_slice %44 {offsets = [0, 0], sizes = [32, 56], strides = [1, 1]} : vector<32x64xbf16> to vector<32x56xbf16>
    %47 = tpu.concatenate %45, %46 in 1 : vector<32x8xbf16>, vector<32x56xbf16> -> vector<32x64xbf16>
    %c2_23 = arith.constant 2 : index
    %c0_24 = arith.constant 0 : index
    %c0_25 = arith.constant 0 : index
    %48 = vector.load %arg3[%c2_23, %c0_24, %c0_25] : memref<9x32x32xbf16, #tpu.memory_space<vmem>>, vector<1x32x32xbf16>
    %49 = vector.shape_cast %48 : vector<1x32x32xbf16> to vector<32x32xbf16>
    %cst_26 = arith.constant dense<0.000000e+00> : vector<32x64xf32>
    %50 = tpu.matmul %49, %47, %cst_26 {dimension_numbers = #tpu.dot_dimension_numbers<[1], [0], [0], [1], [0, 0, 1, 1], [], []>} : vector<32x32xbf16>, vector<32x64xbf16>, vector<32x64xf32> -> vector<32x64xf32>
    %51 = arith.addf %42, %50 : vector<32x64xf32>
    %c0_27 = arith.constant 0 : index
    %c1_28 = arith.constant 1 : index
    %c0_29 = arith.constant 0 : index
    %c0_30 = arith.constant 0 : index
    %52 = vector.load %arg2[%c0_27, %c1_28, %c0_29, %c0_30] : memref<1x4x32x64xbf16, #tpu.memory_space<vmem>>, vector<1x1x32x64xbf16>
    %53 = vector.shape_cast %52 : vector<1x1x32x64xbf16> to vector<32x64xbf16>
    %cst_31 = arith.constant 0.000000e+00 : bf16
    %54 = vector.broadcast %cst_31 : bf16 to vector<32x1xbf16>
    %55 = vector.extract_strided_slice %53 {offsets = [0, 0], sizes = [32, 63], strides = [1, 1]} : vector<32x64xbf16> to vector<32x63xbf16>
    %56 = tpu.concatenate %54, %55 in 1 : vector<32x1xbf16>, vector<32x63xbf16> -> vector<32x64xbf16>
    %57 = vector.broadcast %21 : vector<1x64xbf16> to vector<32x64xbf16>
    %58 = arith.mulf %56, %57 : vector<32x64xbf16>
    %c3_32 = arith.constant 3 : index
    %c0_33 = arith.constant 0 : index
    %c0_34 = arith.constant 0 : index
    %59 = vector.load %arg3[%c3_32, %c0_33, %c0_34] : memref<9x32x32xbf16, #tpu.memory_space<vmem>>, vector<1x32x32xbf16>
    %60 = vector.shape_cast %59 : vector<1x32x32xbf16> to vector<32x32xbf16>
    %cst_35 = arith.constant dense<0.000000e+00> : vector<32x64xf32>
    %61 = tpu.matmul %60, %58, %cst_35 {dimension_numbers = #tpu.dot_dimension_numbers<[1], [0], [0], [1], [0, 0, 1, 1], [], []>} : vector<32x32xbf16>, vector<32x64xbf16>, vector<32x64xf32> -> vector<32x64xf32>
    %62 = arith.addf %51, %61 : vector<32x64xf32>
    %c0_36 = arith.constant 0 : index
    %c0_37 = arith.constant 0 : index
    %c0_38 = arith.constant 0 : index
    %c0_39 = arith.constant 0 : index
    %63 = vector.load %arg2[%c0_36, %c0_37, %c0_38, %c0_39] : memref<1x4x32x64xbf16, #tpu.memory_space<vmem>>, vector<1x1x32x64xbf16>
    %64 = vector.shape_cast %63 : vector<1x1x32x64xbf16> to vector<32x64xbf16>
    %c4 = arith.constant 4 : index
    %c0_40 = arith.constant 0 : index
    %c0_41 = arith.constant 0 : index
    %65 = vector.load %arg3[%c4, %c0_40, %c0_41] : memref<9x32x32xbf16, #tpu.memory_space<vmem>>, vector<1x32x32xbf16>
    %66 = vector.shape_cast %65 : vector<1x32x32xbf16> to vector<32x32xbf16>
    %cst_42 = arith.constant dense<0.000000e+00> : vector<32x64xf32>
    %67 = tpu.matmul %66, %64, %cst_42 {dimension_numbers = #tpu.dot_dimension_numbers<[1], [0], [0], [1], [0, 0, 1, 1], [], []>} : vector<32x32xbf16>, vector<32x64xbf16>, vector<32x64xf32> -> vector<32x64xf32>
    %68 = arith.addf %62, %67 : vector<32x64xf32>
    %c0_43 = arith.constant 0 : index
    %c1_44 = arith.constant 1 : index
    %c0_45 = arith.constant 0 : index
    %c0_46 = arith.constant 0 : index
    %69 = vector.load %arg2[%c0_43, %c1_44, %c0_45, %c0_46] : memref<1x4x32x64xbf16, #tpu.memory_space<vmem>>, vector<1x1x32x64xbf16>
    %70 = vector.shape_cast %69 : vector<1x1x32x64xbf16> to vector<32x64xbf16>
    %c5 = arith.constant 5 : index
    %c0_47 = arith.constant 0 : index
    %c0_48 = arith.constant 0 : index
    %71 = vector.load %arg3[%c5, %c0_47, %c0_48] : memref<9x32x32xbf16, #tpu.memory_space<vmem>>, vector<1x32x32xbf16>
    %72 = vector.shape_cast %71 : vector<1x32x32xbf16> to vector<32x32xbf16>
    %cst_49 = arith.constant dense<0.000000e+00> : vector<32x64xf32>
    %73 = tpu.matmul %72, %70, %cst_49 {dimension_numbers = #tpu.dot_dimension_numbers<[1], [0], [0], [1], [0, 0, 1, 1], [], []>} : vector<32x32xbf16>, vector<32x64xbf16>, vector<32x64xf32> -> vector<32x64xf32>
    %74 = arith.addf %68, %73 : vector<32x64xf32>
    %c0_50 = arith.constant 0 : index
    %c3_51 = arith.constant 3 : index
    %c0_52 = arith.constant 0 : index
    %c0_53 = arith.constant 0 : index
    %75 = vector.load %arg2[%c0_50, %c3_51, %c0_52, %c0_53] : memref<1x4x32x64xbf16, #tpu.memory_space<vmem>>, vector<1x1x32x64xbf16>
    %76 = vector.shape_cast %75 : vector<1x1x32x64xbf16> to vector<32x64xbf16>
    %cst_54 = arith.constant 0.000000e+00 : bf16
    %77 = vector.broadcast %cst_54 : bf16 to vector<32x1xbf16>
    %78 = vector.extract_strided_slice %76 {offsets = [0, 0], sizes = [32, 63], strides = [1, 1]} : vector<32x64xbf16> to vector<32x63xbf16>
    %79 = tpu.concatenate %77, %78 in 1 : vector<32x1xbf16>, vector<32x63xbf16> -> vector<32x64xbf16>
    %80 = vector.broadcast %21 : vector<1x64xbf16> to vector<32x64xbf16>
    %81 = arith.mulf %79, %80 : vector<32x64xbf16>
    %c6 = arith.constant 6 : index
    %c0_55 = arith.constant 0 : index
    %c0_56 = arith.constant 0 : index
    %82 = vector.load %arg3[%c6, %c0_55, %c0_56] : memref<9x32x32xbf16, #tpu.memory_space<vmem>>, vector<1x32x32xbf16>
    %83 = vector.shape_cast %82 : vector<1x32x32xbf16> to vector<32x32xbf16>
    %cst_57 = arith.constant dense<0.000000e+00> : vector<32x64xf32>
    %84 = tpu.matmul %83, %81, %cst_57 {dimension_numbers = #tpu.dot_dimension_numbers<[1], [0], [0], [1], [0, 0, 1, 1], [], []>} : vector<32x32xbf16>, vector<32x64xbf16>, vector<32x64xf32> -> vector<32x64xf32>
    %85 = arith.addf %74, %84 : vector<32x64xf32>
    %c0_58 = arith.constant 0 : index
    %c2_59 = arith.constant 2 : index
    %c0_60 = arith.constant 0 : index
    %c0_61 = arith.constant 0 : index
    %86 = vector.load %arg2[%c0_58, %c2_59, %c0_60, %c0_61] : memref<1x4x32x64xbf16, #tpu.memory_space<vmem>>, vector<1x1x32x64xbf16>
    %87 = vector.shape_cast %86 : vector<1x1x32x64xbf16> to vector<32x64xbf16>
    %c7 = arith.constant 7 : index
    %c0_62 = arith.constant 0 : index
    %c0_63 = arith.constant 0 : index
    %88 = vector.load %arg3[%c7, %c0_62, %c0_63] : memref<9x32x32xbf16, #tpu.memory_space<vmem>>, vector<1x32x32xbf16>
    %89 = vector.shape_cast %88 : vector<1x32x32xbf16> to vector<32x32xbf16>
    %cst_64 = arith.constant dense<0.000000e+00> : vector<32x64xf32>
    %90 = tpu.matmul %89, %87, %cst_64 {dimension_numbers = #tpu.dot_dimension_numbers<[1], [0], [0], [1], [0, 0, 1, 1], [], []>} : vector<32x32xbf16>, vector<32x64xbf16>, vector<32x64xf32> -> vector<32x64xf32>
    %91 = arith.addf %85, %90 : vector<32x64xf32>
    %c0_65 = arith.constant 0 : index
    %c3_66 = arith.constant 3 : index
    %c0_67 = arith.constant 0 : index
    %c0_68 = arith.constant 0 : index
    %92 = vector.load %arg2[%c0_65, %c3_66, %c0_67, %c0_68] : memref<1x4x32x64xbf16, #tpu.memory_space<vmem>>, vector<1x1x32x64xbf16>
    %93 = vector.shape_cast %92 : vector<1x1x32x64xbf16> to vector<32x64xbf16>
    %c8 = arith.constant 8 : index
    %c0_69 = arith.constant 0 : index
    %c0_70 = arith.constant 0 : index
    %94 = vector.load %arg3[%c8, %c0_69, %c0_70] : memref<9x32x32xbf16, #tpu.memory_space<vmem>>, vector<1x32x32xbf16>
    %95 = vector.shape_cast %94 : vector<1x32x32xbf16> to vector<32x32xbf16>
    %cst_71 = arith.constant dense<0.000000e+00> : vector<32x64xf32>
    %96 = tpu.matmul %95, %93, %cst_71 {dimension_numbers = #tpu.dot_dimension_numbers<[1], [0], [0], [1], [0, 0, 1, 1], [], []>} : vector<32x32xbf16>, vector<32x64xbf16>, vector<32x64xf32> -> vector<32x64xf32>
    %97 = arith.addf %91, %96 : vector<32x64xf32>
    %c0_72 = arith.constant 0 : index
    %c0_73 = arith.constant 0 : index
    %98 = vector.load %arg4[%c0_72, %c0_73] : memref<32x1xf32, #tpu.memory_space<vmem>>, vector<32x1xf32>
    %99 = vector.broadcast %98 : vector<32x1xf32> to vector<32x64xf32>
    %100 = arith.addf %97, %99 : vector<32x64xf32>
    %c0_74 = arith.constant 0 : index
    %c0_75 = arith.constant 0 : index
    %c0_76 = arith.constant 0 : index
    %101 = vector.load %arg5[%c0_74, %c0_75, %c0_76] : memref<1x32x64xf32, #tpu.memory_space<vmem>>, vector<1x32x64xf32>
    %102 = vector.shape_cast %101 : vector<1x32x64xf32> to vector<32x64xf32>
    %103 = vector.shape_cast %100 : vector<32x64xf32> to vector<1x32x64xf32>
    tpu.vector_store %arg5[%c0_74, %c0_75, %c0_76], %103 {strides = array<i32>} : memref<1x32x64xf32, #tpu.memory_space<vmem>>, vector<1x32x64xf32>,
    return
  }
  func.func @transform_0(%arg0: i32, %arg1: i32) -> (i32, i32, i32, i32) {
    %c0_i32 = arith.constant 0 : i32
    %c0_i32_0 = arith.constant 0 : i32
    %c0_i32_1 = arith.constant 0 : i32
    %c0_i32_2 = arith.constant 0 : i32
    return %arg0, %c0_i32, %c0_i32_0, %c0_i32_1 : i32, i32, i32, i32
  }
  func.func @transform_1(%arg0: i32, %arg1: i32) -> (i32, i32, i32) {
    %c0_i32 = arith.constant 0 : i32
    %c0_i32_0 = arith.constant 0 : i32
    %c0_i32_1 = arith.constant 0 : i32
    return %c0_i32, %arg1, %c0_i32_0 : i32, i32, i32
  }
  func.func @transform_2(%arg0: i32, %arg1: i32) -> (i32, i32) {
    %c0_i32 = arith.constant 0 : i32
    %c0_i32_0 = arith.constant 0 : i32
    return %arg1, %c0_i32 : i32, i32
  }
  func.func @transform_3(%arg0: i32, %arg1: i32) -> (i32, i32, i32) {
    %c0_i32 = arith.constant 0 : i32
    %c0_i32_0 = arith.constant 0 : i32
    return %arg0, %arg1, %c0_i32 : i32, i32, i32
  }
}

module attributes {stable_mosaic.version = 11 : i64} {
  func.func @_downsample_conv_kernel(%arg0: i32, %arg1: i32, %arg2: memref<1x4x32x64xbf16, #tpu.memory_space<vmem>>, %arg3: memref<9x32x32xbf16, #tpu.memory_space<vmem>>, %arg4: memref<32x1xf32, #tpu.memory_space<vmem>>, %arg5: memref<1x32x64xf32, #tpu.memory_space<vmem>>) attributes {dimension_semantics = [#tpu.dimension_semantics<parallel>, #tpu.dimension_semantics<parallel>], iteration_bounds = array<i64: 2, 1>, scalar_prefetch = 0 : i64, scratch_operands = 0 : i64, tpu.core_type = #tpu.core_type<tc>, window_params = [{transform_indices = @transform_0, window_bounds = array<i64: 1, 4, 32, 64>}, {transform_indices = @transform_1, window_bounds = array<i64: 9, 32, 32>}, {transform_indices = @transform_2, window_bounds = array<i64: 32, 1>}, {transform_indices = @transform_3, window_bounds = array<i64: 1, 32, 64>}]} {
    %0 = tpu.iota {dimensions = array<i32: 1>} : vector<1x64xi32>
    %c8_i32 = arith.constant 8 : i32
    %c0_i32 = arith.constant 0 : i32
    %1 = arith.cmpi eq, %c8_i32, %c0_i32 : i32
    %c1_i32 = arith.constant 1 : i32
    %2 = arith.select %1, %c1_i32, %c8_i32 : i32
    %3 = vector.broadcast %2 : i32 to vector<1x64xi32>
    %4 = arith.remsi %0, %3 : vector<1x64xi32>
    %c0_i32_0 = arith.constant 0 : i32
    %5 = vector.broadcast %c0_i32_0 : i32 to vector<1x64xi32>
    %6 = arith.cmpi ne, %4, %5 : vector<1x64xi32>
    %c0_i32_1 = arith.constant 0 : i32
    %7 = vector.broadcast %c0_i32_1 : i32 to vector<1x64xi32>
    %8 = arith.cmpi slt, %4, %7 : vector<1x64xi32>
    %c0_i32_2 = arith.constant 0 : i32
    %9 = arith.cmpi slt, %2, %c0_i32_2 : i32
    %10 = vector.broadcast %9 : i1 to vector<1x64xi1>
    %11 = vector.broadcast %10 : vector<1x64xi1> to vector<1x64xi1>
    %12 = arith.xori %8, %11 : vector<1x64xi1>
    %13 = arith.andi %12, %6 : vector<1x64xi1>
    %14 = vector.broadcast %2 : i32 to vector<1x64xi32>
    %15 = arith.addi %4, %14 : vector<1x64xi32>
    %16 = arith.select %13, %15, %4 : vector<1x64xi1>, vector<1x64xi32>
    %c1_i32_3 = arith.constant 1 : i32
    %17 = vector.broadcast %c1_i32_3 : i32 to vector<1x64xi32>
    %18 = arith.cmpi sge, %16, %17 : vector<1x64xi32>
    %19 = arith.extui %18 : vector<1x64xi1> to vector<1x64xi32>
    %20 = arith.sitofp %19 : vector<1x64xi32> to vector<1x64xf32>
    %21 = arith.truncf %20 : vector<1x64xf32> to vector<1x64xbf16>
    %cst = arith.constant 0.000000e+00 : f32
    %22 = vector.broadcast %cst : f32 to vector<32x64xf32>
    %c0 = arith.constant 0 : index
    %c3 = arith.constant 3 : index
    %c0_4 = arith.constant 0 : index
    %c0_5 = arith.constant 0 : index
    %23 = vector.load %arg2[%c0, %c3, %c0_4, %c0_5] : memref<1x4x32x64xbf16, #tpu.memory_space<vmem>>, vector<1x1x32x64xbf16>
    %24 = vector.shape_cast %23 : vector<1x1x32x64xbf16> to vector<32x64xbf16>
    %cst_6 = arith.constant 0.000000e+00 : bf16
    %25 = vector.broadcast %cst_6 : bf16 to vector<32x9xbf16>
    %26 = vector.extract_strided_slice %24 {offsets = [0, 0], sizes = [32, 55], strides = [1, 1]} : vector<32x64xbf16> to vector<32x55xbf16>
    %27 = tpu.concatenate %25, %26 in 1 : vector<32x9xbf16>, vector<32x55xbf16> -> vector<32x64xbf16>
    %28 = vector.broadcast %21 : vector<1x64xbf16> to vector<32x64xbf16>
    %29 = arith.mulf %27, %28 : vector<32x64xbf16>
    %c0_7 = arith.constant 0 : index
    %c0_8 = arith.constant 0 : index
    %c0_9 = arith.constant 0 : index
    %30 = vector.load %arg3[%c0_7, %c0_8, %c0_9] : memref<9x32x32xbf16, #tpu.memory_space<vmem>>, vector<1x32x32xbf16>
    %31 = vector.shape_cast %30 : vector<1x32x32xbf16> to vector<32x32xbf16>
    %cst_10 = arith.constant dense<0.000000e+00> : vector<32x64xf32>
    %32 = tpu.matmul %31, %29, %cst_10 {dimension_numbers = #tpu.dot_dimension_numbers<[1], [0], [0], [1], [0, 0, 1, 1], [], []>} : vector<32x32xbf16>, vector<32x64xbf16>, vector<32x64xf32> -> vector<32x64xf32>
    %33 = arith.addf %22, %32 : vector<32x64xf32>
    %c0_11 = arith.constant 0 : index
    %c2 = arith.constant 2 : index
    %c0_12 = arith.constant 0 : index
    %c0_13 = arith.constant 0 : index
    %34 = vector.load %arg2[%c0_11, %c2, %c0_12, %c0_13] : memref<1x4x32x64xbf16, #tpu.memory_space<vmem>>, vector<1x1x32x64xbf16>
    %35 = vector.shape_cast %34 : vector<1x1x32x64xbf16> to vector<32x64xbf16>
    %cst_14 = arith.constant 0.000000e+00 : bf16
    %36 = vector.broadcast %cst_14 : bf16 to vector<32x8xbf16>
    %37 = vector.extract_strided_slice %35 {offsets = [0, 0], sizes = [32, 56], strides = [1, 1]} : vector<32x64xbf16> to vector<32x56xbf16>
    %38 = tpu.concatenate %36, %37 in 1 : vector<32x8xbf16>, vector<32x56xbf16> -> vector<32x64xbf16>
    %c1 = arith.constant 1 : index
    %c0_15 = arith.constant 0 : index
    %c0_16 = arith.constant 0 : index
    %39 = vector.load %arg3[%c1, %c0_15, %c0_16] : memref<9x32x32xbf16, #tpu.memory_space<vmem>>, vector<1x32x32xbf16>
    %40 = vector.shape_cast %39 : vector<1x32x32xbf16> to vector<32x32xbf16>
    %cst_17 = arith.constant dense<0.000000e+00> : vector<32x64xf32>
    %41 = tpu.matmul %40, %38, %cst_17 {dimension_numbers = #tpu.dot_dimension_numbers<[1], [0], [0], [1], [0, 0, 1, 1], [], []>} : vector<32x32xbf16>, vector<32x64xbf16>, vector<32x64xf32> -> vector<32x64xf32>
    %42 = arith.addf %33, %41 : vector<32x64xf32>
    %c0_18 = arith.constant 0 : index
    %c3_19 = arith.constant 3 : index
    %c0_20 = arith.constant 0 : index
    %c0_21 = arith.constant 0 : index
    %43 = vector.load %arg2[%c0_18, %c3_19, %c0_20, %c0_21] : memref<1x4x32x64xbf16, #tpu.memory_space<vmem>>, vector<1x1x32x64xbf16>
    %44 = vector.shape_cast %43 : vector<1x1x32x64xbf16> to vector<32x64xbf16>
    %cst_22 = arith.constant 0.000000e+00 : bf16
    %45 = vector.broadcast %cst_22 : bf16 to vector<32x8xbf16>
    %46 = vector.extract_strided_slice %44 {offsets = [0, 0], sizes = [32, 56], strides = [1, 1]} : vector<32x64xbf16> to vector<32x56xbf16>
    %47 = tpu.concatenate %45, %46 in 1 : vector<32x8xbf16>, vector<32x56xbf16> -> vector<32x64xbf16>
    %c2_23 = arith.constant 2 : index
    %c0_24 = arith.constant 0 : index
    %c0_25 = arith.constant 0 : index
    %48 = vector.load %arg3[%c2_23, %c0_24, %c0_25] : memref<9x32x32xbf16, #tpu.memory_space<vmem>>, vector<1x32x32xbf16>
    %49 = vector.shape_cast %48 : vector<1x32x32xbf16> to vector<32x32xbf16>
    %cst_26 = arith.constant dense<0.000000e+00> : vector<32x64xf32>
    %50 = tpu.matmul %49, %47, %cst_26 {dimension_numbers = #tpu.dot_dimension_numbers<[1], [0], [0], [1], [0, 0, 1, 1], [], []>} : vector<32x32xbf16>, vector<32x64xbf16>, vector<32x64xf32> -> vector<32x64xf32>
    %51 = arith.addf %42, %50 : vector<32x64xf32>
    %c0_27 = arith.constant 0 : index
    %c1_28 = arith.constant 1 : index
    %c0_29 = arith.constant 0 : index
    %c0_30 = arith.constant 0 : index
    %52 = vector.load %arg2[%c0_27, %c1_28, %c0_29, %c0_30] : memref<1x4x32x64xbf16, #tpu.memory_space<vmem>>, vector<1x1x32x64xbf16>
    %53 = vector.shape_cast %52 : vector<1x1x32x64xbf16> to vector<32x64xbf16>
    %cst_31 = arith.constant 0.000000e+00 : bf16
    %54 = vector.broadcast %cst_31 : bf16 to vector<32x1xbf16>
    %55 = vector.extract_strided_slice %53 {offsets = [0, 0], sizes = [32, 63], strides = [1, 1]} : vector<32x64xbf16> to vector<32x63xbf16>
    %56 = tpu.concatenate %54, %55 in 1 : vector<32x1xbf16>, vector<32x63xbf16> -> vector<32x64xbf16>
    %57 = vector.broadcast %21 : vector<1x64xbf16> to vector<32x64xbf16>
    %58 = arith.mulf %56, %57 : vector<32x64xbf16>
    %c3_32 = arith.constant 3 : index
    %c0_33 = arith.constant 0 : index
    %c0_34 = arith.constant 0 : index
    %59 = vector.load %arg3[%c3_32, %c0_33, %c0_34] : memref<9x32x32xbf16, #tpu.memory_space<vmem>>, vector<1x32x32xbf16>
    %60 = vector.shape_cast %59 : vector<1x32x32xbf16> to vector<32x32xbf16>
    %cst_35 = arith.constant dense<0.000000e+00> : vector<32x64xf32>
    %61 = tpu.matmul %60, %58, %cst_35 {dimension_numbers = #tpu.dot_dimension_numbers<[1], [0], [0], [1], [0, 0, 1, 1], [], []>} : vector<32x32xbf16>, vector<32x64xbf16>, vector<32x64xf32> -> vector<32x64xf32>
    %62 = arith.addf %51, %61 : vector<32x64xf32>
    %c0_36 = arith.constant 0 : index
    %c0_37 = arith.constant 0 : index
    %c0_38 = arith.constant 0 : index
    %c0_39 = arith.constant 0 : index
    %63 = vector.load %arg2[%c0_36, %c0_37, %c0_38, %c0_39] : memref<1x4x32x64xbf16, #tpu.memory_space<vmem>>, vector<1x1x32x64xbf16>
    %64 = vector.shape_cast %63 : vector<1x1x32x64xbf16> to vector<32x64xbf16>
    %c4 = arith.constant 4 : index
    %c0_40 = arith.constant 0 : index
    %c0_41 = arith.constant 0 : index
    %65 = vector.load %arg3[%c4, %c0_40, %c0_41] : memref<9x32x32xbf16, #tpu.memory_space<vmem>>, vector<1x32x32xbf16>
    %66 = vector.shape_cast %65 : vector<1x32x32xbf16> to vector<32x32xbf16>
    %cst_42 = arith.constant dense<0.000000e+00> : vector<32x64xf32>
    %67 = tpu.matmul %66, %64, %cst_42 {dimension_numbers = #tpu.dot_dimension_numbers<[1], [0], [0], [1], [0, 0, 1, 1], [], []>} : vector<32x32xbf16>, vector<32x64xbf16>, vector<32x64xf32> -> vector<32x64xf32>
    %68 = arith.addf %62, %67 : vector<32x64xf32>
    %c0_43 = arith.constant 0 : index
    %c1_44 = arith.constant 1 : index
    %c0_45 = arith.constant 0 : index
    %c0_46 = arith.constant 0 : index
    %69 = vector.load %arg2[%c0_43, %c1_44, %c0_45, %c0_46] : memref<1x4x32x64xbf16, #tpu.memory_space<vmem>>, vector<1x1x32x64xbf16>
    %70 = vector.shape_cast %69 : vector<1x1x32x64xbf16> to vector<32x64xbf16>
    %c5 = arith.constant 5 : index
    %c0_47 = arith.constant 0 : index
    %c0_48 = arith.constant 0 : index
    %71 = vector.load %arg3[%c5, %c0_47, %c0_48] : memref<9x32x32xbf16, #tpu.memory_space<vmem>>, vector<1x32x32xbf16>
    %72 = vector.shape_cast %71 : vector<1x32x32xbf16> to vector<32x32xbf16>
    %cst_49 = arith.constant dense<0.000000e+00> : vector<32x64xf32>
    %73 = tpu.matmul %72, %70, %cst_49 {dimension_numbers = #tpu.dot_dimension_numbers<[1], [0], [0], [1], [0, 0, 1, 1], [], []>} : vector<32x32xbf16>, vector<32x64xbf16>, vector<32x64xf32> -> vector<32x64xf32>
    %74 = arith.addf %68, %73 : vector<32x64xf32>
    %c0_50 = arith.constant 0 : index
    %c3_51 = arith.constant 3 : index
    %c0_52 = arith.constant 0 : index
    %c0_53 = arith.constant 0 : index
    %75 = vector.load %arg2[%c0_50, %c3_51, %c0_52, %c0_53] : memref<1x4x32x64xbf16, #tpu.memory_space<vmem>>, vector<1x1x32x64xbf16>
    %76 = vector.shape_cast %75 : vector<1x1x32x64xbf16> to vector<32x64xbf16>
    %cst_54 = arith.constant 0.000000e+00 : bf16
    %77 = vector.broadcast %cst_54 : bf16 to vector<32x1xbf16>
    %78 = vector.extract_strided_slice %76 {offsets = [0, 0], sizes = [32, 63], strides = [1, 1]} : vector<32x64xbf16> to vector<32x63xbf16>
    %79 = tpu.concatenate %77, %78 in 1 : vector<32x1xbf16>, vector<32x63xbf16> -> vector<32x64xbf16>
    %80 = vector.broadcast %21 : vector<1x64xbf16> to vector<32x64xbf16>
    %81 = arith.mulf %79, %80 : vector<32x64xbf16>
    %c6 = arith.constant 6 : index
    %c0_55 = arith.constant 0 : index
    %c0_56 = arith.constant 0 : index
    %82 = vector.load %arg3[%c6, %c0_55, %c0_56] : memref<9x32x32xbf16, #tpu.memory_space<vmem>>, vector<1x32x32xbf16>
    %83 = vector.shape_cast %82 : vector<1x32x32xbf16> to vector<32x32xbf16>
    %cst_57 = arith.constant dense<0.000000e+00> : vector<32x64xf32>
    %84 = tpu.matmul %83, %81, %cst_57 {dimension_numbers = #tpu.dot_dimension_numbers<[1], [0], [0], [1], [0, 0, 1, 1], [], []>} : vector<32x32xbf16>, vector<32x64xbf16>, vector<32x64xf32> -> vector<32x64xf32>
    %85 = arith.addf %74, %84 : vector<32x64xf32>
    %c0_58 = arith.constant 0 : index
    %c2_59 = arith.constant 2 : index
    %c0_60 = arith.constant 0 : index
    %c0_61 = arith.constant 0 : index
    %86 = vector.load %arg2[%c0_58, %c2_59, %c0_60, %c0_61] : memref<1x4x32x64xbf16, #tpu.memory_space<vmem>>, vector<1x1x32x64xbf16>
    %87 = vector.shape_cast %86 : vector<1x1x32x64xbf16> to vector<32x64xbf16>
    %c7 = arith.constant 7 : index
    %c0_62 = arith.constant 0 : index
    %c0_63 = arith.constant 0 : index
    %88 = vector.load %arg3[%c7, %c0_62, %c0_63] : memref<9x32x32xbf16, #tpu.memory_space<vmem>>, vector<1x32x32xbf16>
    %89 = vector.shape_cast %88 : vector<1x32x32xbf16> to vector<32x32xbf16>
    %cst_64 = arith.constant dense<0.000000e+00> : vector<32x64xf32>
    %90 = tpu.matmul %89, %87, %cst_64 {dimension_numbers = #tpu.dot_dimension_numbers<[1], [0], [0], [1], [0, 0, 1, 1], [], []>} : vector<32x32xbf16>, vector<32x64xbf16>, vector<32x64xf32> -> vector<32x64xf32>
    %91 = arith.addf %85, %90 : vector<32x64xf32>
    %c0_65 = arith.constant 0 : index
    %c3_66 = arith.constant 3 : index
    %c0_67 = arith.constant 0 : index
    %c0_68 = arith.constant 0 : index
    %92 = vector.load %arg2[%c0_65, %c3_66, %c0_67, %c0_68] : memref<1x4x32x64xbf16, #tpu.memory_space<vmem>>, vector<1x1x32x64xbf16>
    %93 = vector.shape_cast %92 : vector<1x1x32x64xbf16> to vector<32x64xbf16>
    %c8 = arith.constant 8 : index
    %c0_69 = arith.constant 0 : index
    %c0_70 = arith.constant 0 : index
    %94 = vector.load %arg3[%c8, %c0_69, %c0_70] : memref<9x32x32xbf16, #tpu.memory_space<vmem>>, vector<1x32x32xbf16>
    %95 = vector.shape_cast %94 : vector<1x32x32xbf16> to vector<32x32xbf16>
    %cst_71 = arith.constant dense<0.000000e+00> : vector<32x64xf32>
    %96 = tpu.matmul %95, %93, %cst_71 {dimension_numbers = #tpu.dot_dimension_numbers<[1], [0], [0], [1], [0, 0, 1, 1], [], []>} : vector<32x32xbf16>, vector<32x64xbf16>, vector<32x64xf32> -> vector<32x64xf32>
    %97 = arith.addf %91, %96 : vector<32x64xf32>
    %c0_72 = arith.constant 0 : index
    %c0_73 = arith.constant 0 : index
    %98 = vector.load %arg4[%c0_72, %c0_73] : memref<32x1xf32, #tpu.memory_space<vmem>>, vector<32x1xf32>
    %99 = vector.broadcast %98 : vector<32x1xf32> to vector<32x64xf32>
    %100 = arith.addf %97, %99 : vector<32x64xf32>
    %c0_74 = arith.constant 0 : index
    %c0_75 = arith.constant 0 : index
    %c0_76 = arith.constant 0 : index
    %101 = vector.load %arg5[%c0_74, %c0_75, %c0_76] : memref<1x32x64xf32, #tpu.memory_space<vmem>>, vector<1x32x64xf32>
    %102 = vector.shape_cast %101 : vector<1x32x64xf32> to vector<32x64xf32>
    %103 = vector.shape_cast %100 : vector<32x64xf32> to vector<1x32x64xf32>
    tpu.vector_store %arg5[%c0_74, %c0_75, %c0_76], %103 {strides = array<i32>} : memref<1x32x64xf32, #tpu.memory_space<vmem>>, vector<1x32x64xf32>,
    return
  }
  func.func @transform_0(%arg0: i32, %arg1: i32) -> (i32, i32, i32, i32) {
    %c0_i32 = arith.constant 0 : i32
    %c0_i32_0 = arith.constant 0 : i32
    %c0_i32_1 = arith.constant 0 : i32
    %c0_i32_2 = arith.constant 0 : i32
    return %arg0, %c0_i32, %c0_i32_0, %c0_i32_1 : i32, i32, i32, i32
  }
  func.func @transform_1(%arg0: i32, %arg1: i32) -> (i32, i32, i32) {
    %c0_i32 = arith.constant 0 : i32
    %c0_i32_0 = arith.constant 0 : i32
    %c0_i32_1 = arith.constant 0 : i32
    return %c0_i32, %arg1, %c0_i32_0 : i32, i32, i32
  }
  func.func @transform_2(%arg0: i32, %arg1: i32) -> (i32, i32) {
    %c0_i32 = arith.constant 0 : i32
    %c0_i32_0 = arith.constant 0 : i32
    return %arg1, %c0_i32 : i32, i32
  }
  func.func @transform_3(%arg0: i32, %arg1: i32) -> (i32, i32, i32) {
    %c0_i32 = arith.constant 0 : i32
    %c0_i32_0 = arith.constant 0 : i32
    return %arg0, %arg1, %c0_i32 : i32, i32, i32
  }
}

</mosaic_0001>

<bundles_post_ra>
// kernel: tpu_custom_call.1
= control target key start
LH: loop header
LB: loop body
LE: loop exit
PB: predicated region body
PF: predicated region fallthrough
CT: control target
= control target key end

     0   :  { %8 = vsyncpa [#allocation3], 0  ;;  %s1982_s0 = inlined_call_operand.hbm [shape: bf16[2,4,32,64], index: 0, kind: input, shape index: {}]   ;;  %s1983_s1 = inlined_call_operand.hbm [shape: bf16[9,32,32], index: 1, kind: input, shape index: {}]   ;;  %s1984_s2 = inlined_call_operand.vmem [shape: f32[32,1], index: 2, kind: input, shape index: {}]   ;;  %s1985_s3 = inlined_call_operand.hbm [shape: f32[2,32,64], index: 3, kind: output, shape index: {}]  }
   0x1   :  { %10 = vsyncpa [#allocation3 + $0x1], 0 }
   0x2   :  { %11 = vsyncpa [#allocation6], 0 }
   0x3   :  { %12 = vsyncpa [#allocation4], 0 }
   0x4   :  { %14 = vsyncpa [#allocation4 + $0x1], 0  ;;  %s1687_s12 = smov 0   ;;  %s1689_s13 = smov 0  }
   0x5   :  { %s1691_s14 = smov 0   ;;  %s1693_s15 = smov 0  }
   0x6   :  { %s1695_s16 = smov 0   ;;  %s1697_s17 = smov 0  }
   0x7 LB: > { %s1214_s18 = sadd.s32 4294967295, %s1654_s17   ;;  %s1215_s19 = sadd.s32 4294967294, %s1654_s17   ;;  %s1654_s17 = sphi %s1697_s17, %s20_s17   ;;  %s1650_s16 = sphi %s1695_s16, %s2009_s16   ;;  %s1646_s15 = sphi %s1693_s15, %s2008_s15   ;;  %s1642_s14 = sphi %s1691_s14, %s2007_s14   ;;  %s1638_s13 = sphi %s1689_s13, %s2006_s13   ;;  %s1634_s12 = sphi %s1687_s12, %s2005_s12  }
   0x8   : > { %p52_p0 = scmp.ne.s32.totalorder %s1638_s13, %s1634_s12  ;;  %p1721_p1 = scmp.eq.s32.totalorder %s1214_s18, 0 }
   0x9   : > { %p1725_p2 = scmp.eq.s32.totalorder %s1214_s18, 1  ;;  %p136_p3 = scmp.eq.s32.totalorder %s1215_s19, 1 }
   0xa   : > { %p1731_p4 = por %p1721_p1, %p52_p0  ;;  %p1216_p5 = scmp.ge.s32.totalorder %s1654_s17, 1 }
   0xb   : > { %p1736_p6 = por %p136_p3, %p52_p0  ;;  %p143_p7 = scmp.lt.s32.totalorder %s1654_s17, 3 }
   0xc   : > { %s1991_s22 = scalar_select %p1731_p4, 1, 0 }
   0xd   : > { %s1992_s23 = scalar_select %p1736_p6, 1, 0 }
   0xe   : > { %p1741_p8 = pnand %p1216_p5, %p143_p7  ;;  %s1656_s25 = smov [#allocation5]  }
   0xf   : > { %s158_s26 = sshll.u32 %s1656_s25, 4  ;;  %s32_s28 = sadd.s32 1, %s1650_s16  ;;  %s159_s26 = int_to_ptr.vmem [resolvable:$true] %s158_s26 }
  0x10   : > { %p1415_p9 = pneg %p1741_p8  ;;  %s1527_s29 = scalar_lea.vmem %s159_s26, 2304 }
  0x11   : > { %p1528_p13 = scmp.ne.s32.totalorder %s159_s26, %s1527_s29  ;;  %p1535_p5 = scmp.lt.s32.totalorder %s159_s26, %s159_s26 }
  0x12   : > { %p1750_p11 = pnand %p1415_p9, %p1721_p1  ;;  %p1536_p7 = scmp.lt.s32.totalorder %s1527_s29, %s1527_s29 }
  0x14   : > { %p1518_p12 = pneg %p1750_p11  ;;  %p1537_p6 = por %p1536_p7, %p1535_p5 }
  0x16   : > { %p1530_p0 = pnand %p1528_p13, %p1518_p12 }
  0x18   : > { %p1531_p3 = pneg %p1530_p0 }
  0x1a   : > { %p1538_p4 = pnand %p1537_p6, %p1531_p3 }
  0x1c   : > { %1541 = shalt.err (!%p1538_p4)
}
  0x1d   : > { %s1987_s30 = smov 64   ;;  %s1988_s4 = smov 4  }
  0x1e   : > { %1418 = dma.hbm_to_vmem [thread:$0]  (!%p1750_p11), %s1983_s1, 2304, %s159_s26, [#allocation6], %s1987_s30, %s1987_s30, %s1988_s4  }
  0x1f   : > { %p34_p4 = scmp.ge.s32.totalorder %s32_s28, 2  ;;  %s39_s7 = sadd.s32 1, %s1642_s14 }
  0x20   : > { %p46_p6 = scmp.ne.s32.totalorder %s1642_s14, %s1638_s13  ;;  %p47_p9 = scmp.eq.s32.totalorder %s1654_s17, 0 }
  0x21   : > { %s2011_s28 = smov (%p34_p4, %s32_s28), 0  ;;  %p1428_p0 = scmp.lt.s32.totalorder %s1654_s17, 2 }
  0x22   : > { %p1771_p12 = por %p47_p9, %p46_p6  ;;  %p1777_p13 = por %p1725_p2, %p46_p6 }
  0x23   : > { %s36_s10 = ssub.s32 %s1650_s16, %s2011_s28  ;;  %s181_s11 = sand.u32 1, %s1642_s14  }
  0x24   : > { %p37_p11 = scmp.eq.s32.totalorder %s36_s10, 0  ;;  %s1220_s18 = sshll.u32 %s181_s11, 6 }
  0x25   : > { %s1297_s25 = sshll.u32 %s1650_s16, 10  ;;  %s185_s5 = scalar_lea.vmem [#allocation2], %s1220_s18 }
  0x26   : > { %s1786_s19 = scalar_select %p37_p11, %s1642_s14, %s39_s7  }
  0x27   : > { %s191_s29 = scalar_lea.hbm %s1982_s0, %s1297_s25  ;;  %s192_s6 = sshll.u32 %s185_s5, 4  ;;  %s193_s6 = int_to_ptr.vmem [resolvable:$true] %s192_s6 }
  0x28   : > { %p1794_p2 = pnand %p1428_p0, %p1771_p12  ;;  %s182_s30 = scalar_lea.sflag [#allocation3], %s181_s11 }
  0x29   : > { %s1555_s10 = scalar_lea.vmem %s193_s6, 1024  ;;  %s1659_s7 = smov [#allocation2]  }
  0x2a   : > { %p1544_p3 = pneg %p1794_p2  ;;  %p1556_p5 = scmp.ne.s32.totalorder %s193_s6, %s1555_s10 }
  0x2b   : > { %s1560_s4 = sshll.u32 %s1659_s7, 4  ;;  %s1561_s4 = int_to_ptr.vmem [resolvable:$false] %s1560_s4 }
  0x2c   : > { %p1558_p7 = pnand %p1556_p5, %p1544_p3  ;;  %s1562_s25 = scalar_lea.vmem %s1561_s4, 2048 }
  0x2d   : > { %p1563_p6 = scmp.lt.s32.totalorder %s193_s6, %s1561_s4  ;;  %p1564_p9 = scmp.lt.s32.totalorder %s1562_s25, %s1555_s10 }
  0x2e   : > { %p1559_p4 = pneg %p1558_p7 }
  0x2f   : > { %p1565_p11 = por %p1564_p9, %p1563_p6 }
  0x31   : > { %p1566_p10 = pnand %p1565_p11, %p1559_p4 }
  0x33   : > { %1569 = shalt.err (!%p1566_p10)
}
  0x34   : > { %s1998_s8 = smov 4   ;;  %s1999_s18 = smov 64  }
  0x35   : > { %1422 = dma.hbm_to_vmem [thread:$0]  (!%p1794_p2), %s191_s29, 1024, %s193_s6, %s182_s30, %s1999_s18, %s1999_s18, %s1998_s8  }
  0x36   : > { %204 = sbr.rel (%p1741_p8) target bundleno = 436 (0x1b4), region = 32  ;;  %s1808_s11 = sand.u32 (!%p1741_p8), 1, %s1638_s13  }
  0x37   : > { %s1224_s4 = sshll.u32 (!%p1741_p8), %s1808_s11, 6  ;;  %s207_s26 = scalar_lea.sflag (!%p1741_p8), [#allocation3], %s1808_s11 }
  0x38   : > { %s1812_s27 = scalar_lea.vmem (!%p1741_p8), [#allocation2], %s1224_s4  ;;  %p2000_p10 = scmp.ne.s32.totalorder (!%p1741_p8), %s1991_s22, 0 }
  0x3b   : > { %1621 = dma.done.wait (%p2000_p10), %s207_s26, 1024  }
  0x3c   : > { %1623 = vsyncadd (%p2000_p10), %s207_s26, 4294966272 }
  0x3d   : > { %1625 = dma.done.wait (%p1721_p1), [#allocation6], 2304  }
  0x3e   : > { %1627 = vsyncadd (%p1721_p1), [#allocation6], 4294964992  ;;  %v1823_v0 = vld [vmem:[%s1812_s27 + $0x28] sm:$0xff]   ;;  %v1826_v1 = vld [vmem:[%s1812_s27 + $0x20] sm:$0xff]   ;;  %s1660_s24 = smov 8   ;;  %vm343_vm0 = vcmask 261120   ;;  %v251_v13 = vlaneseq }
  0x3f   : > { %319 = vrot.lane.b32.xlu0 %v1823_v0, %s1660_s24  ;;  %v1831_v2 = vld [vmem:[%s1812_s27 + $0x38] sm:$0xff]   ;;  %317 = vrot.lane.b32.xlu1 %v1826_v1, %s1660_s24  ;;  %v1836_v3 = vld [vmem:[%s1812_s27 + $0x30] sm:$0xff]   ;;  %s1661_s20 = smov 9   ;;  %v1498_v6 = vld [vmem:[#allocation5] sm:$0xff]   ;;  %s1662_s22 = smov 1   ;;  %v1663_v10 = vmov 0  }
  0x40   : > { %v1496_v4 = vld [vmem:[#allocation5 + $0x10] sm:$0xff]   ;;  %v1841_v5 = vld [vmem:[%s1812_s27 + $0x18] sm:$0xff]   ;;  %1347 = vmatprep.mubr.msk.bf16.mxu1 %vm343_vm0, %v1498_v6  ;;  %v1055_v8 = vld [vmem:[%s1984_s2 + $0x8] sm:$0xff]  ;;  %1489 = vset.pattern.permute.xlu1 %v1663_v10  ;;  %v252_v14 = vand.u32 127, %v251_v13  ;;  %vm321_vm1 = vcmask 64512   ;;  %v1664_v17 = vmov 0.0  }
  0x41   : > { %1339 = vmatprep.mubr.msk.bf16.mxu0 %vm343_vm0, %v1496_v4  ;;  %v1849_v7 = vld [vmem:[%s1812_s27 + $0x10] sm:$0xff]   ;;  %v1054_v9 = vld [vmem:[%s1984_s2] sm:$0xff]  ;;  %1488 = vset.pattern.permute.xlu0 %v1663_v10  ;;  %v1057_v12 = vld [vmem:[%s1984_s2 + $0x18] sm:$0xff]  ;;  %vm288_vm4 = vcmask 72704   ;;  %vm567_vm5 = vcmask 7168   ;;  %s1226_s8 = sshll.u32 %s1808_s11, 5 }
  0x42   : > { %v1056_v11 = vld [vmem:[%s1984_s2 + $0x10] sm:$0xff]  ;;  %v257_v15 = vand.u32 7, %v252_v14  ;;  %vm1868_vm3 = vmneg %vm321_vm1  ;;  %v1497_v25 = vld [vmem:[#allocation5 + $0x18] sm:$0xff]   ;;  %vm1082_vm6 = vcmask 523264   ;;  %s241_s18 = scalar_lea.vmem [#allocation7], %s1226_s8  ;;  %s1298_s26 = sshll.u32 %s1646_s15, 9 }
  0x43   : > { %286 = vrot.lane.b32.xlu0 %v1831_v2, %s1661_s20  ;;  %284 = vrot.lane.b32.xlu1 %v1836_v3, %s1661_s20  ;;  %v1500_v29 = vld [vmem:[#allocation5 + $0x20] sm:$0xff]   ;;  %v1499_v35 = vld [vmem:[#allocation5 + $0x8] sm:$0xff]   ;;  %v1504_v38 = vld [vmem:[#allocation5 + $0x30] sm:$0xff]   ;;  %s1103_s4 = sshll.u32 %s241_s18, 4  ;;  %s1088_s15 = scalar_lea.sflag [#allocation4], %s1808_s11  ;;  %s1926_s4 = int_to_ptr.vmem [resolvable:$true] %s1103_s4 }
  0x44   : > { %vm265_vm2 = vcmp.ge.s32.totalorder %v257_v15, 1  ;;  %v1502_v36 = vld [vmem:[%s1812_s27 + $0x8] sm:$0xff]   ;;  %v1506_v42 = vld [vmem:[#allocation5 + $0x40] sm:$0xff]   ;;  %v1505_v48 = vld [vmem:[#allocation5 + $0x38] sm:$0xff]   ;;  %s1570_s30 = scalar_lea.vmem %s1926_s4, 512  ;;  %s1665_s29 = smov [#allocation7]  }
  0x45   : > { %v1227_v18 = vsel %vm265_vm2, 1.0, %v1664_v17  ;;  %v1501_v40 = vld [vmem:[#allocation5 + $0x28] sm:$0xff]   ;;  %v1503_v43 = vld [vmem:[%s1812_s27] sm:$0xff]   ;;  %v1508_v50 = vld [vmem:[#allocation5 + $0x50] sm:$0xff]   ;;  %p1571_p1 = scmp.ne.s32.totalorder %s1926_s4, %s1570_s30  ;;  %s1574_s5 = sshll.u32 %s1665_s29, 4  ;;  %s1575_s5 = int_to_ptr.vmem [resolvable:$false] %s1574_s5 }
  0x46   : > { %v268_v21 = vpack.c.bf16 %v1227_v18, %v1227_v18  ;;  %v1507_v51 = vld [vmem:[#allocation5 + $0x48] sm:$0xff]   ;;  %v1510_v52 = vld [vmem:[#allocation5 + $0x60] sm:$0xff]   ;;  %v1509_v54 = vld [vmem:[#allocation5 + $0x58] sm:$0xff]   ;;  %s1576_s6 = scalar_lea.vmem %s1575_s5, 1024  ;;  %p1577_p0 = scmp.lt.s32.totalorder %s1926_s4, %s1575_s5 }
  0x47   : > { %466 = vrot.lane.b32.xlu0 %v1831_v2, %s1660_s24  ;;  %565 = vrot.lane.b32.xlu1 %v1841_v5, %s1662_s22  ;;  %v1512_v55 = vld [vmem:[#allocation5 + $0x70] sm:$0xff]   ;;  %v1511_v56 = vld [vmem:[#allocation5 + $0x68] sm:$0xff]   ;;  %v1514_v57 = vld [vmem:[#allocation5 + $0x80] sm:$0xff]   ;;  %p1572_p8 = pnand %p1571_p1, %p1777_p13  ;;  %p1578_p2 = scmp.lt.s32.totalorder %s1576_s6, %s1570_s30 }
  0x48   : > { %v1513_v58 = vld [vmem:[#allocation5 + $0x78] sm:$0xff]   ;;  %v1515_v59 = vld [vmem:[#allocation5 + $0x88] sm:$0xff]  }
  0x49   : > { %p1573_p12 = pneg %p1572_p8  ;;  %p1579_p3 = por %p1578_p2, %p1577_p0 }
  0x4b   : > { %464 = vrot.lane.b32.xlu0 %v1836_v3, %s1660_s24  ;;  %563 = vrot.lane.b32.xlu1 %v1849_v7, %s1662_s22  ;;  %p1580_p5 = pnand %p1579_p3, %p1573_p12 }
  0x4f   : > { %818 = vrot.lane.b32.xlu0 %v1831_v2, %s1662_s22  ;;  %816 = vrot.lane.b32.xlu1 %v1836_v3, %s1662_s22  ;;  %s1932_s22 = scalar_lea.hbm %s1985_s3, %s1298_s26 }
  0x53   : > { %1065 = vperm.xlu1 %1489, %v1055_v8   ;;  %1060 = vperm.xlu0 %1488, %v1054_v9  }
  0x57   : > { %1070 = vperm.xlu1 %1489, %v1056_v11   ;;  %1075 = vperm.xlu0 %1488, %v1057_v12  }
  0xb1   : > { %v320_v19 = vpop.permute.xlu0 %319  ;;  %v318_v20 = vpop.permute.xlu1 %317 }
  0xb2   : > { %1335 = vmatprep.subr.msk.bf16.mxu0 %vm1868_vm3, %v320_v19 }
  0xb3   : > { %1336 = vmatpush3.bf16.msk.msra.mxu0 %vm1868_vm3, %v320_v19 }
  0xb4   : > { %1337 = vmatprep.subr.msk.bf16.mxu0 %vm1868_vm3, %v318_v20 }
  0xb5   : > { %v287_v22 = vpop.permute.xlu0 %286  ;;  %v285_v24 = vpop.permute.xlu1 %284 }
  0xb6   : > { %v294_v23 = vsel %vm288_vm4, 0, %v287_v22  ;;  %v291_v27 = vsel %vm288_vm4, 0, %v285_v24 }
  0xb7   : > { %1338 = vmatpush3.bf16.msk.msra.mxu0 %vm1868_vm3, %v318_v20  ;;  %v297_v26 = vmul.bf16 %v294_v23, %v268_v21  ;;  %v296_v28 = vmul.bf16 %v291_v27, %v268_v21 }
  0xb9   : > { %1343 = vmatprep.subr.bf16.mxu1 %v297_v26  ;;  %v467_v30 = vpop.permute.xlu0 %466  ;;  %v566_v31 = vpop.permute.xlu1 %565 }
  0xba   : > { %1340 = vmatmul.mubr.msk.bf16.vlgmr.msra.gmra.mxu0 %vm343_vm0, %v1497_v25  ;;  %1344 = vmatpush3.bf16.msra.mxu1 %v297_v26  ;;  %v572_v32 = vsel %vm567_vm5, 0, %v566_v31 }
  0xbb   : > { %1351 = vmatprep.subr.msk.bf16.mxu0 %vm1868_vm3, %v467_v30  ;;  %1345 = vmatprep.subr.bf16.mxu1 %v296_v28  ;;  %v575_v33 = vmul.bf16 %v572_v32, %v268_v21 }
  0xbc   : > { %1352 = vmatpush3.bf16.msk.msra.mxu0 %vm1868_vm3, %v467_v30  ;;  %1355 = vmatprep.mubr.msk.bf16.mxu0 %vm343_vm0, %v1500_v29 }
  0xbd   : > { %v465_v34 = vpop.permute.xlu0 %464  ;;  %v564_v37 = vpop.permute.xlu1 %563 }
  0xbe   : > { %1346 = vmatpush3.bf16.msra.mxu1 %v296_v28  ;;  %1353 = vmatprep.subr.msk.bf16.mxu0 %vm1868_vm3, %v465_v34  ;;  %v569_v39 = vsel %vm567_vm5, 0, %v564_v37 }
  0xbf   : > { %1359 = vmatprep.subr.bf16.mxu1 %v575_v33  ;;  %v574_v41 = vmul.bf16 %v569_v39, %v268_v21 }
  0xc0   : > { %1354 = vmatpush3.bf16.msk.msra.mxu0 %vm1868_vm3, %v465_v34 }
  0xc1   : > { %1348 = vmatmul.mubr.msk.bf16.vlgmr.msra.gmra.mxu1 %vm343_vm0, %v1499_v35  ;;  %1367 = vmatprep.subr.bf16.mxu0 %v1502_v36  ;;  %v819_v44 = vpop.permute.xlu0 %818  ;;  %v817_v46 = vpop.permute.xlu1 %816 }
  0xc2   : > { %1360 = vmatpush3.bf16.msra.mxu1 %v575_v33  ;;  %v824_v45 = vsel %vm567_vm5, 0, %v819_v44  ;;  %1363 = vmatprep.mubr.msk.bf16.mxu1 %vm343_vm0, %v1504_v38  ;;  %v821_v49 = vsel %vm567_vm5, 0, %v817_v46 }
  0xc3   : > { %1356 = vmatmul.mubr.msk.bf16.vlgmr.msra.gmra.mxu0 %vm343_vm0, %v1501_v40  ;;  %1361 = vmatprep.subr.bf16.mxu1 %v574_v41  ;;  %v827_v47 = vmul.bf16 %v824_v45, %v268_v21  ;;  %v826_v53 = vmul.bf16 %v821_v49, %v268_v21 }
  0xc4   : > { %1368 = vmatpush3.bf16.msra.mxu0 %v1502_v36  ;;  %1371 = vmatprep.mubr.msk.bf16.mxu0 %vm343_vm0, %v1506_v42 }
  0xc5   : > { %1369 = vmatprep.subr.bf16.mxu0 %v1503_v43 }
  0xc6   : > { %1362 = vmatpush3.bf16.msra.mxu1 %v574_v41 }
  0xc7   : > { %1375 = vmatprep.subr.bf16.mxu1 %v1841_v5 }
  0xc8   : > { %1370 = vmatpush3.bf16.msra.mxu0 %v1503_v43 }
  0xc9   : > { %1364 = vmatmul.mubr.msk.bf16.vlgmr.msra.gmra.mxu1 %vm343_vm0, %v1505_v48  ;;  %1383 = vmatprep.subr.bf16.mxu0 %v827_v47 }
  0xca   : > { %1376 = vmatpush3.bf16.msra.mxu1 %v1841_v5  ;;  %1379 = vmatprep.mubr.msk.bf16.mxu1 %vm343_vm0, %v1508_v50 }
  0xcb   : > { %1372 = vmatmul.mubr.msk.bf16.vlgmr.msra.gmra.mxu0 %vm343_vm0, %v1507_v51  ;;  %1377 = vmatprep.subr.bf16.mxu1 %v1849_v7 }
  0xcc   : > { %1384 = vmatpush3.bf16.msra.mxu0 %v827_v47  ;;  %1387 = vmatprep.mubr.msk.bf16.mxu0 %vm343_vm0, %v1510_v52 }
  0xcd   : > { %1385 = vmatprep.subr.bf16.mxu0 %v826_v53 }
  0xce   : > { %1378 = vmatpush3.bf16.msra.mxu1 %v1849_v7  ;;  %v1066_v34 = vpop.permute.xlu1 %1065  ;;  %v1061_v49 = vpop.permute.xlu0 %1060 }
  0xcf   : > { %1391 = vmatprep.subr.bf16.mxu1 %v1823_v0 }
  0xd0   : > { %1386 = vmatpush3.bf16.msra.mxu0 %v826_v53 }
  0xd1   : > { %1380 = vmatmul.mubr.msk.bf16.vlgmr.msra.gmra.mxu1 %vm343_vm0, %v1509_v54  ;;  %1399 = vmatprep.subr.bf16.mxu0 %v1831_v2 }
  0xd2   : > { %1392 = vmatpush3.bf16.msra.mxu1 %v1823_v0  ;;  %1395 = vmatprep.mubr.msk.bf16.mxu1 %vm343_vm0, %v1512_v55  ;;  %v1071_v50 = vpop.permute.xlu1 %1070 }
  0xd3   : > { %1388 = vmatmul.mubr.msk.bf16.vlgmr.msra.gmra.mxu0 %vm343_vm0, %v1511_v56  ;;  %1393 = vmatprep.subr.bf16.mxu1 %v1826_v1 }
  0xd4   : > { %1400 = vmatpush3.bf16.msra.mxu0 %v1831_v2  ;;  %1403 = vmatprep.mubr.msk.bf16.mxu0 %vm343_vm0, %v1514_v57 }
  0xd5   : > { %1401 = vmatprep.subr.bf16.mxu0 %v1836_v3 }
  0xd6   : > { %1394 = vmatpush3.bf16.msra.mxu1 %v1826_v1 }
  0xd8   : > { %1402 = vmatpush3.bf16.msra.mxu0 %v1836_v3 }
  0xd9   : > { %1396 = vmatmul.mubr.msk.bf16.vlgmr.msra.gmra.mxu1 %vm343_vm0, %v1513_v58 }
  0xdb   : > { %1404 = vmatmul.mubr.msk.bf16.vlgmr.msra.gmra.mxu0 %vm343_vm0, %v1515_v59 }
 0x17a   : > { %v1341_v60 = vpop.f32.mrf.mxu0 }
 0x17c   : > { %v384_v61 = vpop.f32.mrf.mxu0 }
 0x17e   : > { %v1342_v62 = vpop.f32.mrf.mxu0 }
 0x180   : > { %v387_v63 = vpop.f32.mrf.mxu0 }
 0x181   : > { %v1349_v0 = vpop.f32.mrf.mxu1 }
 0x182   : > { %v458_v9 = vadd.f32 %v1349_v0, %v1341_v60 }
 0x183   : > { %v1357_v2 = vpop.f32.mrf.mxu0  ;;  %v449_v4 = vpop.f32.mrf.mxu1 }
 0x184   : > { %v450_v11 = vadd.f32 %v449_v4, %v384_v61  ;;  %v546_v13 = vadd.f32 %v1357_v2, %v458_v9 }
 0x185   : > { %v529_v5 = vpop.f32.mrf.mxu0  ;;  %v1350_v6 = vpop.f32.mrf.mxu1 }
 0x186   : > { %v461_v14 = vadd.f32 %v1350_v6, %v1342_v62  ;;  %v544_v17 = vadd.f32 %v529_v5, %v450_v11  ;;  %v1076_v5 = vpop.permute.xlu0 %1075 }
 0x187   : > { %v1358_v7 = vpop.f32.mrf.mxu0  ;;  %v452_v8 = vpop.f32.mrf.mxu1 }
 0x188   : > { %v453_v18 = vadd.f32 %v452_v8, %v387_v63  ;;  %v547_v22 = vadd.f32 %v1358_v7, %v461_v14 }
 0x189   : > { %v532_v1 = vpop.f32.mrf.mxu0  ;;  %v1365_v10 = vpop.f32.mrf.mxu1 }
 0x18a   : > { %v648_v19 = vadd.f32 %v1365_v10, %v546_v13  ;;  %v545_v26 = vadd.f32 %v532_v1, %v453_v18 }
 0x18b   : > { %v1373_v3 = vpop.f32.mrf.mxu0  ;;  %v631_v12 = vpop.f32.mrf.mxu1 }
 0x18c   : > { %v646_v23 = vadd.f32 %v631_v12, %v544_v17  ;;  %v738_v27 = vadd.f32 %v1373_v3, %v648_v19 }
 0x18d   : > { %v721_v15 = vpop.f32.mrf.mxu0  ;;  %v1366_v16 = vpop.f32.mrf.mxu1 }
 0x18e   : > { %v649_v28 = vadd.f32 %v1366_v16, %v547_v22  ;;  %v736_v31 = vadd.f32 %v721_v15, %v646_v23 }
 0x18f   : > { %v1374_v20 = vpop.f32.mrf.mxu0  ;;  %v634_v21 = vpop.f32.mrf.mxu1 }
 0x190   : > { %v647_v32 = vadd.f32 %v634_v21, %v545_v26  ;;  %v739_v37 = vadd.f32 %v1374_v20, %v649_v28 }
 0x191   : > { %v724_v24 = vpop.f32.mrf.mxu0  ;;  %v1381_v25 = vpop.f32.mrf.mxu1 }
 0x192   : > { %v814_v33 = vadd.f32 %v1381_v25, %v738_v27  ;;  %v737_v41 = vadd.f32 %v724_v24, %v647_v32 }
 0x193   : > { %v1389_v29 = vpop.f32.mrf.mxu0  ;;  %v797_v30 = vpop.f32.mrf.mxu1 }
 0x194   : > { %v812_v38 = vadd.f32 %v797_v30, %v736_v31  ;;  %v900_v42 = vadd.f32 %v1389_v29, %v814_v33 }
 0x195   : > { %v883_v35 = vpop.f32.mrf.mxu0  ;;  %v1382_v36 = vpop.f32.mrf.mxu1 }
 0x196   : > { %v815_v43 = vadd.f32 %v1382_v36, %v739_v37  ;;  %v898_v46 = vadd.f32 %v883_v35, %v812_v38 }
 0x197   : > { %v1390_v39 = vpop.f32.mrf.mxu0  ;;  %v800_v40 = vpop.f32.mrf.mxu1 }
 0x198   : > { %v813_v47 = vadd.f32 %v800_v40, %v737_v41  ;;  %v901_v53 = vadd.f32 %v1390_v39, %v815_v43 }
 0x199   : > { %v886_v44 = vpop.f32.mrf.mxu0  ;;  %v1397_v45 = vpop.f32.mrf.mxu1 }
 0x19a   : > { %v976_v48 = vadd.f32 %v1397_v45, %v900_v42  ;;  %v899_v58 = vadd.f32 %v886_v44, %v813_v47 }
 0x19b   : > { %v1405_v51 = vpop.f32.mrf.mxu0  ;;  %v959_v52 = vpop.f32.mrf.mxu1 }
 0x19c   : > { %v1052_v54 = vadd.f32 %v1405_v51, %v976_v48  ;;  %v974_v55 = vadd.f32 %v959_v52, %v898_v46 }
 0x19d   : > { %v1035_v56 = vpop.f32.mrf.mxu0  ;;  %v1398_v57 = vpop.f32.mrf.mxu1 }
 0x19e   : > { %v1050_v59 = vadd.f32 %v1035_v56, %v974_v55  ;;  %v977_v60 = vadd.f32 %v1398_v57, %v901_v53  ;;  %v1080_v61 = vadd.f32 %v1071_v50, %v1052_v54 }
 0x19f   : > { %v1406_v62 = vpop.f32.mrf.mxu0  ;;  %v962_v63 = vpop.f32.mrf.mxu1 }
 0x1a0   : > { %v1078_v0 = vadd.f32 %v1061_v49, %v1050_v59  ;;  %1085 = vst.msk [vmem:[%s241_s18 + $0x10] sm:$0xff] %vm1082_vm6, %v1080_v61  ;;  %v1053_v2 = vadd.f32 %v1406_v62, %v977_v60  ;;  %v975_v4 = vadd.f32 %v962_v63, %v899_v58 }
 0x1a1   : > { %v1038_v6 = vpop.f32.mrf.mxu0 }
 0x1a2   : > { %1083 = vst.msk [vmem:[%s241_s18] sm:$0xff] %vm1082_vm6, %v1078_v0  ;;  %v1081_v7 = vadd.f32 %v1076_v5, %v1053_v2  ;;  %v1051_v8 = vadd.f32 %v1038_v6, %v975_v4 }
 0x1a4   : > { %1086 = vst.msk [vmem:[%s241_s18 + $0x18] sm:$0xff] %vm1082_vm6, %v1081_v7  ;;  %v1079_v9 = vadd.f32 %v1066_v34, %v1051_v8 }
 0x1a6   : > { %1084 = vst.msk [vmem:[%s241_s18 + $0x8] sm:$0xff] %vm1082_vm6, %v1079_v9 }
 0x1a7   : > { %1583 = shalt.err (!%p1580_p5)
}
 0x1a8   : > { %s1584_s21 = scalar_lea.hbm %s1932_s22, 512  ;;  %s1588_s25 = scalar_lea.hbm %s1985_s3, 1024 }
 0x1a9   : > { %p1585_p7 = scmp.ne.s32.totalorder %s1932_s22, %s1584_s21  ;;  %p1589_p9 = scmp.lt.s32.totalorder %s1932_s22, %s1985_s3 }
 0x1aa   : > { %p1590_p11 = scmp.lt.s32.totalorder %s1588_s25, %s1584_s21 }
 0x1ab   : > { %p1586_p4 = pnand %p1585_p7, %p1777_p13 }
 0x1ac   : > { %p1591_p10 = por %p1590_p11, %p1589_p9 }
 0x1ad   : > { %p1587_p6 = pneg %p1586_p4 }
 0x1af   : > { %p1592_p1 = pnand %p1591_p10, %p1587_p6 }
 0x1b1   : > { %1595 = shalt.err (!%p1592_p1)
}
 0x1b2   : > { %s1666_s26 = smov 128  }
 0x1b3   : > { %1413 = dma.vmem_to_hbm [thread:$0]  (%p1777_p13), %s1926_s4, 512, %s1932_s22, %s1088_s15, %s1666_s26, %s1666_s26, %s1660_s24  }
 0x1b4 PF: > { %s1118_s27 = sand.u32 1, %s1634_s12   ;;  %p2003_p8 = scmp.ne.s32.totalorder %s1992_s23, 0 }
 0x1b5   : > { %p2004_p12 = scmp.ge.s32.totalorder %s1654_s17, 2  ;;  %s1119_s20 = scalar_lea.sflag [#allocation4], %s1118_s27 }
 0x1b7   : > { %p1424_p0 = pnand %p2004_p12, %p2003_p8 }
 0x1b9   : > { %p1425_p2 = pneg %p1424_p0 }
 0x1bb   : > { %1629 = dma.done.wait (%p1425_p2), %s1119_s20, 512  }
 0x1bc   : > { %1631 = vsyncadd (%p1425_p2), %s1119_s20, 4294966784  ;;  %s20_s17 = sadd.s32 1, %s1654_s17   ;;  %s2005_s12 = smov %s1638_s13 }
 0x1bd   : > { %p17_p3 = scmp.ge.s32.totalorder %s20_s17, 4   ;;  %s2006_s13 = smov %s1642_s14 }
 0x1be   : > { %s2007_s14 = smov %s1786_s19  ;;  %s2008_s15 = smov %s1650_s16 }
 0x1bf   : > { %s2009_s16 = smov %s2011_s28  ;;  %19 = sbr.rel (!%p17_p3) target bundleno = 7 (0x7), region = 96 }
 0x1c4   :  { %1124 = vsyncpa [#allocation3], 1 }
 0x1c5   :  { %1126 = vsyncpa [#allocation3 + $0x1], 1 }
 0x1c6   :  { %1127 = vsyncpa [#allocation6], 1 }
 0x1c7   :  { %1128 = vsyncpa [#allocation4], 1 }
 0x1c8   :  { %1130 = vsyncpa [#allocation4 + $0x1], 1 }

// kernel: tpu_custom_call.1
= control target key start
LH: loop header
LB: loop body
LE: loop exit
PB: predicated region body
PF: predicated region fallthrough
CT: control target
= control target key end

     0   :  { %8 = vsyncpa [#allocation3], 0  ;;  %s1982_s0 = inlined_call_operand.hbm [shape: bf16[2,4,32,64], index: 0, kind: input, shape index: {}]   ;;  %s1983_s1 = inlined_call_operand.hbm [shape: bf16[9,32,32], index: 1, kind: input, shape index: {}]   ;;  %s1984_s2 = inlined_call_operand.vmem [shape: f32[32,1], index: 2, kind: input, shape index: {}]   ;;  %s1985_s3 = inlined_call_operand.hbm [shape: f32[2,32,64], index: 3, kind: output, shape index: {}]  }
   0x1   :  { %10 = vsyncpa [#allocation3 + $0x1], 0 }
   0x2   :  { %11 = vsyncpa [#allocation6], 0 }
   0x3   :  { %12 = vsyncpa [#allocation4], 0 }
   0x4   :  { %14 = vsyncpa [#allocation4 + $0x1], 0  ;;  %s1687_s12 = smov 0   ;;  %s1689_s13 = smov 0  }
   0x5   :  { %s1691_s14 = smov 0   ;;  %s1693_s15 = smov 0  }
   0x6   :  { %s1695_s16 = smov 0   ;;  %s1697_s17 = smov 0  }
   0x7 LB: > { %s1214_s18 = sadd.s32 4294967295, %s1654_s17   ;;  %s1215_s19 = sadd.s32 4294967294, %s1654_s17   ;;  %s1654_s17 = sphi %s1697_s17, %s20_s17   ;;  %s1650_s16 = sphi %s1695_s16, %s2009_s16   ;;  %s1646_s15 = sphi %s1693_s15, %s2008_s15   ;;  %s1642_s14 = sphi %s1691_s14, %s2007_s14   ;;  %s1638_s13 = sphi %s1689_s13, %s2006_s13   ;;  %s1634_s12 = sphi %s1687_s12, %s2005_s12  }
   0x8   : > { %p52_p0 = scmp.ne.s32.totalorder %s1638_s13, %s1634_s12  ;;  %p1721_p1 = scmp.eq.s32.totalorder %s1214_s18, 0 }
   0x9   : > { %p1725_p2 = scmp.eq.s32.totalorder %s1214_s18, 1  ;;  %p136_p3 = scmp.eq.s32.totalorder %s1215_s19, 1 }
   0xa   : > { %p1731_p4 = por %p1721_p1, %p52_p0  ;;  %p1216_p5 = scmp.ge.s32.totalorder %s1654_s17, 1 }
   0xb   : > { %p1736_p6 = por %p136_p3, %p52_p0  ;;  %p143_p7 = scmp.lt.s32.totalorder %s1654_s17, 3 }
   0xc   : > { %s1991_s22 = scalar_select %p1731_p4, 1, 0 }
   0xd   : > { %s1992_s23 = scalar_select %p1736_p6, 1, 0 }
   0xe   : > { %p1741_p8 = pnand %p1216_p5, %p143_p7  ;;  %s1656_s25 = smov [#allocation5]  }
   0xf   : > { %s158_s26 = sshll.u32 %s1656_s25, 4  ;;  %s32_s28 = sadd.s32 1, %s1650_s16  ;;  %s159_s26 = int_to_ptr.vmem [resolvable:$true] %s158_s26 }
  0x10   : > { %p1415_p9 = pneg %p1741_p8  ;;  %s1527_s29 = scalar_lea.vmem %s159_s26, 2304 }
  0x11   : > { %p1528_p13 = scmp.ne.s32.totalorder %s159_s26, %s1527_s29  ;;  %p1535_p5 = scmp.lt.s32.totalorder %s159_s26, %s159_s26 }
  0x12   : > { %p1750_p11 = pnand %p1415_p9, %p1721_p1  ;;  %p1536_p7 = scmp.lt.s32.totalorder %s1527_s29, %s1527_s29 }
  0x14   : > { %p1518_p12 = pneg %p1750_p11  ;;  %p1537_p6 = por %p1536_p7, %p1535_p5 }
  0x16   : > { %p1530_p0 = pnand %p1528_p13, %p1518_p12 }
  0x18   : > { %p1531_p3 = pneg %p1530_p0 }
  0x1a   : > { %p1538_p4 = pnand %p1537_p6, %p1531_p3 }
  0x1c   : > { %1541 = shalt.err (!%p1538_p4)
}
  0x1d   : > { %s1987_s30 = smov 64   ;;  %s1988_s4 = smov 4  }
  0x1e   : > { %1418 = dma.hbm_to_vmem [thread:$0]  (!%p1750_p11), %s1983_s1, 2304, %s159_s26, [#allocation6], %s1987_s30, %s1987_s30, %s1988_s4  }
  0x1f   : > { %p34_p4 = scmp.ge.s32.totalorder %s32_s28, 2  ;;  %s39_s7 = sadd.s32 1, %s1642_s14 }
  0x20   : > { %p46_p6 = scmp.ne.s32.totalorder %s1642_s14, %s1638_s13  ;;  %p47_p9 = scmp.eq.s32.totalorder %s1654_s17, 0 }
  0x21   : > { %s2011_s28 = smov (%p34_p4, %s32_s28), 0  ;;  %p1428_p0 = scmp.lt.s32.totalorder %s1654_s17, 2 }
  0x22   : > { %p1771_p12 = por %p47_p9, %p46_p6  ;;  %p1777_p13 = por %p1725_p2, %p46_p6 }
  0x23   : > { %s36_s10 = ssub.s32 %s1650_s16, %s2011_s28  ;;  %s181_s11 = sand.u32 1, %s1642_s14  }
  0x24   : > { %p37_p11 = scmp.eq.s32.totalorder %s36_s10, 0  ;;  %s1220_s18 = sshll.u32 %s181_s11, 6 }
  0x25   : > { %s1297_s25 = sshll.u32 %s1650_s16, 10  ;;  %s185_s5 = scalar_lea.vmem [#allocation2], %s1220_s18 }
  0x26   : > { %s1786_s19 = scalar_select %p37_p11, %s1642_s14, %s39_s7  }
  0x27   : > { %s191_s29 = scalar_lea.hbm %s1982_s0, %s1297_s25  ;;  %s192_s6 = sshll.u32 %s185_s5, 4  ;;  %s193_s6 = int_to_ptr.vmem [resolvable:$true] %s192_s6 }
  0x28   : > { %p1794_p2 = pnand %p1428_p0, %p1771_p12  ;;  %s182_s30 = scalar_lea.sflag [#allocation3], %s181_s11 }
  0x29   : > { %s1555_s10 = scalar_lea.vmem %s193_s6, 1024  ;;  %s1659_s7 = smov [#allocation2]  }
  0x2a   : > { %p1544_p3 = pneg %p1794_p2  ;;  %p1556_p5 = scmp.ne.s32.totalorder %s193_s6, %s1555_s10 }
  0x2b   : > { %s1560_s4 = sshll.u32 %s1659_s7, 4  ;;  %s1561_s4 = int_to_ptr.vmem [resolvable:$false] %s1560_s4 }
  0x2c   : > { %p1558_p7 = pnand %p1556_p5, %p1544_p3  ;;  %s1562_s25 = scalar_lea.vmem %s1561_s4, 2048 }
  0x2d   : > { %p1563_p6 = scmp.lt.s32.totalorder %s193_s6, %s1561_s4  ;;  %p1564_p9 = scmp.lt.s32.totalorder %s1562_s25, %s1555_s10 }
  0x2e   : > { %p1559_p4 = pneg %p1558_p7 }
  0x2f   : > { %p1565_p11 = por %p1564_p9, %p1563_p6 }
  0x31   : > { %p1566_p10 = pnand %p1565_p11, %p1559_p4 }
  0x33   : > { %1569 = shalt.err (!%p1566_p10)
}
  0x34   : > { %s1998_s8 = smov 4   ;;  %s1999_s18 = smov 64  }
  0x35   : > { %1422 = dma.hbm_to_vmem [thread:$0]  (!%p1794_p2), %s191_s29, 1024, %s193_s6, %s182_s30, %s1999_s18, %s1999_s18, %s1998_s8  }
  0x36   : > { %204 = sbr.rel (%p1741_p8) target bundleno = 436 (0x1b4), region = 32  ;;  %s1808_s11 = sand.u32 (!%p1741_p8), 1, %s1638_s13  }
  0x37   : > { %s1224_s4 = sshll.u32 (!%p1741_p8), %s1808_s11, 6  ;;  %s207_s26 = scalar_lea.sflag (!%p1741_p8), [#allocation3], %s1808_s11 }
  0x38   : > { %s1812_s27 = scalar_lea.vmem (!%p1741_p8), [#allocation2], %s1224_s4  ;;  %p2000_p10 = scmp.ne.s32.totalorder (!%p1741_p8), %s1991_s22, 0 }
  0x3b   : > { %1621 = dma.done.wait (%p2000_p10), %s207_s26, 1024  }
  0x3c   : > { %1623 = vsyncadd (%p2000_p10), %s207_s26, 4294966272 }
  0x3d   : > { %1625 = dma.done.wait (%p1721_p1), [#allocation6], 2304  }
  0x3e   : > { %1627 = vsyncadd (%p1721_p1), [#allocation6], 4294964992  ;;  %v1823_v0 = vld [vmem:[%s1812_s27 + $0x28] sm:$0xff]   ;;  %v1826_v1 = vld [vmem:[%s1812_s27 + $0x20] sm:$0xff]   ;;  %s1660_s24 = smov 8   ;;  %vm343_vm0 = vcmask 261120   ;;  %v251_v13 = vlaneseq }
  0x3f   : > { %319 = vrot.lane.b32.xlu0 %v1823_v0, %s1660_s24  ;;  %v1831_v2 = vld [vmem:[%s1812_s27 + $0x38] sm:$0xff]   ;;  %317 = vrot.lane.b32.xlu1 %v1826_v1, %s1660_s24  ;;  %v1836_v3 = vld [vmem:[%s1812_s27 + $0x30] sm:$0xff]   ;;  %s1661_s20 = smov 9   ;;  %v1498_v6 = vld [vmem:[#allocation5] sm:$0xff]   ;;  %s1662_s22 = smov 1   ;;  %v1663_v10 = vmov 0  }
  0x40   : > { %v1496_v4 = vld [vmem:[#allocation5 + $0x10] sm:$0xff]   ;;  %v1841_v5 = vld [vmem:[%s1812_s27 + $0x18] sm:$0xff]   ;;  %1347 = vmatprep.mubr.msk.bf16.mxu1 %vm343_vm0, %v1498_v6  ;;  %v1055_v8 = vld [vmem:[%s1984_s2 + $0x8] sm:$0xff]  ;;  %1489 = vset.pattern.permute.xlu1 %v1663_v10  ;;  %v252_v14 = vand.u32 127, %v251_v13  ;;  %vm321_vm1 = vcmask 64512   ;;  %v1664_v17 = vmov 0.0  }
  0x41   : > { %1339 = vmatprep.mubr.msk.bf16.mxu0 %vm343_vm0, %v1496_v4  ;;  %v1849_v7 = vld [vmem:[%s1812_s27 + $0x10] sm:$0xff]   ;;  %v1054_v9 = vld [vmem:[%s1984_s2] sm:$0xff]  ;;  %1488 = vset.pattern.permute.xlu0 %v1663_v10  ;;  %v1057_v12 = vld [vmem:[%s1984_s2 + $0x18] sm:$0xff]  ;;  %vm288_vm4 = vcmask 72704   ;;  %vm567_vm5 = vcmask 7168   ;;  %s1226_s8 = sshll.u32 %s1808_s11, 5 }
  0x42   : > { %v1056_v11 = vld [vmem:[%s1984_s2 + $0x10] sm:$0xff]  ;;  %v257_v15 = vand.u32 7, %v252_v14  ;;  %vm1868_vm3 = vmneg %vm321_vm1  ;;  %v1497_v25 = vld [vmem:[#allocation5 + $0x18] sm:$0xff]   ;;  %vm1082_vm6 = vcmask 523264   ;;  %s241_s18 = scalar_lea.vmem [#allocation7], %s1226_s8  ;;  %s1298_s26 = sshll.u32 %s1646_s15, 9 }
  0x43   : > { %286 = vrot.lane.b32.xlu0 %v1831_v2, %s1661_s20  ;;  %284 = vrot.lane.b32.xlu1 %v1836_v3, %s1661_s20  ;;  %v1500_v29 = vld [vmem:[#allocation5 + $0x20] sm:$0xff]   ;;  %v1499_v35 = vld [vmem:[#allocation5 + $0x8] sm:$0xff]   ;;  %v1504_v38 = vld [vmem:[#allocation5 + $0x30] sm:$0xff]   ;;  %s1103_s4 = sshll.u32 %s241_s18, 4  ;;  %s1088_s15 = scalar_lea.sflag [#allocation4], %s1808_s11  ;;  %s1926_s4 = int_to_ptr.vmem [resolvable:$true] %s1103_s4 }
  0x44   : > { %vm265_vm2 = vcmp.ge.s32.totalorder %v257_v15, 1  ;;  %v1502_v36 = vld [vmem:[%s1812_s27 + $0x8] sm:$0xff]   ;;  %v1506_v42 = vld [vmem:[#allocation5 + $0x40] sm:$0xff]   ;;  %v1505_v48 = vld [vmem:[#allocation5 + $0x38] sm:$0xff]   ;;  %s1570_s30 = scalar_lea.vmem %s1926_s4, 512  ;;  %s1665_s29 = smov [#allocation7]  }
  0x45   : > { %v1227_v18 = vsel %vm265_vm2, 1.0, %v1664_v17  ;;  %v1501_v40 = vld [vmem:[#allocation5 + $0x28] sm:$0xff]   ;;  %v1503_v43 = vld [vmem:[%s1812_s27] sm:$0xff]   ;;  %v1508_v50 = vld [vmem:[#allocation5 + $0x50] sm:$0xff]   ;;  %p1571_p1 = scmp.ne.s32.totalorder %s1926_s4, %s1570_s30  ;;  %s1574_s5 = sshll.u32 %s1665_s29, 4  ;;  %s1575_s5 = int_to_ptr.vmem [resolvable:$false] %s1574_s5 }
  0x46   : > { %v268_v21 = vpack.c.bf16 %v1227_v18, %v1227_v18  ;;  %v1507_v51 = vld [vmem:[#allocation5 + $0x48] sm:$0xff]   ;;  %v1510_v52 = vld [vmem:[#allocation5 + $0x60] sm:$0xff]   ;;  %v1509_v54 = vld [vmem:[#allocation5 + $0x58] sm:$0xff]   ;;  %s1576_s6 = scalar_lea.vmem %s1575_s5, 1024  ;;  %p1577_p0 = scmp.lt.s32.totalorder %s1926_s4, %s1575_s5 }
  0x47   : > { %466 = vrot.lane.b32.xlu0 %v1831_v2, %s1660_s24  ;;  %565 = vrot.lane.b32.xlu1 %v1841_v5, %s1662_s22  ;;  %v1512_v55 = vld [vmem:[#allocation5 + $0x70] sm:$0xff]   ;;  %v1511_v56 = vld [vmem:[#allocation5 + $0x68] sm:$0xff]   ;;  %v1514_v57 = vld [vmem:[#allocation5 + $0x80] sm:$0xff]   ;;  %p1572_p8 = pnand %p1571_p1, %p1777_p13  ;;  %p1578_p2 = scmp.lt.s32.totalorder %s1576_s6, %s1570_s30 }
  0x48   : > { %v1513_v58 = vld [vmem:[#allocation5 + $0x78] sm:$0xff]   ;;  %v1515_v59 = vld [vmem:[#allocation5 + $0x88] sm:$0xff]  }
  0x49   : > { %p1573_p12 = pneg %p1572_p8  ;;  %p1579_p3 = por %p1578_p2, %p1577_p0 }
  0x4b   : > { %464 = vrot.lane.b32.xlu0 %v1836_v3, %s1660_s24  ;;  %563 = vrot.lane.b32.xlu1 %v1849_v7, %s1662_s22  ;;  %p1580_p5 = pnand %p1579_p3, %p1573_p12 }
  0x4f   : > { %818 = vrot.lane.b32.xlu0 %v1831_v2, %s1662_s22  ;;  %816 = vrot.lane.b32.xlu1 %v1836_v3, %s1662_s22  ;;  %s1932_s22 = scalar_lea.hbm %s1985_s3, %s1298_s26 }
  0x53   : > { %1065 = vperm.xlu1 %1489, %v1055_v8   ;;  %1060 = vperm.xlu0 %1488, %v1054_v9  }
  0x57   : > { %1070 = vperm.xlu1 %1489, %v1056_v11   ;;  %1075 = vperm.xlu0 %1488, %v1057_v12  }
  0xb1   : > { %v320_v19 = vpop.permute.xlu0 %319  ;;  %v318_v20 = vpop.permute.xlu1 %317 }
  0xb2   : > { %1335 = vmatprep.subr.msk.bf16.mxu0 %vm1868_vm3, %v320_v19 }
  0xb3   : > { %1336 = vmatpush3.bf16.msk.msra.mxu0 %vm1868_vm3, %v320_v19 }
  0xb4   : > { %1337 = vmatprep.subr.msk.bf16.mxu0 %vm1868_vm3, %v318_v20 }
  0xb5   : > { %v287_v22 = vpop.permute.xlu0 %286  ;;  %v285_v24 = vpop.permute.xlu1 %284 }
  0xb6   : > { %v294_v23 = vsel %vm288_vm4, 0, %v287_v22  ;;  %v291_v27 = vsel %vm288_vm4, 0, %v285_v24 }
  0xb7   : > { %1338 = vmatpush3.bf16.msk.msra.mxu0 %vm1868_vm3, %v318_v20  ;;  %v297_v26 = vmul.bf16 %v294_v23, %v268_v21  ;;  %v296_v28 = vmul.bf16 %v291_v27, %v268_v21 }
  0xb9   : > { %1343 = vmatprep.subr.bf16.mxu1 %v297_v26  ;;  %v467_v30 = vpop.permute.xlu0 %466  ;;  %v566_v31 = vpop.permute.xlu1 %565 }
  0xba   : > { %1340 = vmatmul.mubr.msk.bf16.vlgmr.msra.gmra.mxu0 %vm343_vm0, %v1497_v25  ;;  %1344 = vmatpush3.bf16.msra.mxu1 %v297_v26  ;;  %v572_v32 = vsel %vm567_vm5, 0, %v566_v31 }
  0xbb   : > { %1351 = vmatprep.subr.msk.bf16.mxu0 %vm1868_vm3, %v467_v30  ;;  %1345 = vmatprep.subr.bf16.mxu1 %v296_v28  ;;  %v575_v33 = vmul.bf16 %v572_v32, %v268_v21 }
  0xbc   : > { %1352 = vmatpush3.bf16.msk.msra.mxu0 %vm1868_vm3, %v467_v30  ;;  %1355 = vmatprep.mubr.msk.bf16.mxu0 %vm343_vm0, %v1500_v29 }
  0xbd   : > { %v465_v34 = vpop.permute.xlu0 %464  ;;  %v564_v37 = vpop.permute.xlu1 %563 }
  0xbe   : > { %1346 = vmatpush3.bf16.msra.mxu1 %v296_v28  ;;  %1353 = vmatprep.subr.msk.bf16.mxu0 %vm1868_vm3, %v465_v34  ;;  %v569_v39 = vsel %vm567_vm5, 0, %v564_v37 }
  0xbf   : > { %1359 = vmatprep.subr.bf16.mxu1 %v575_v33  ;;  %v574_v41 = vmul.bf16 %v569_v39, %v268_v21 }
  0xc0   : > { %1354 = vmatpush3.bf16.msk.msra.mxu0 %vm1868_vm3, %v465_v34 }
  0xc1   : > { %1348 = vmatmul.mubr.msk.bf16.vlgmr.msra.gmra.mxu1 %vm343_vm0, %v1499_v35  ;;  %1367 = vmatprep.subr.bf16.mxu0 %v1502_v36  ;;  %v819_v44 = vpop.permute.xlu0 %818  ;;  %v817_v46 = vpop.permute.xlu1 %816 }
  0xc2   : > { %1360 = vmatpush3.bf16.msra.mxu1 %v575_v33  ;;  %v824_v45 = vsel %vm567_vm5, 0, %v819_v44  ;;  %1363 = vmatprep.mubr.msk.bf16.mxu1 %vm343_vm0, %v1504_v38  ;;  %v821_v49 = vsel %vm567_vm5, 0, %v817_v46 }
  0xc3   : > { %1356 = vmatmul.mubr.msk.bf16.vlgmr.msra.gmra.mxu0 %vm343_vm0, %v1501_v40  ;;  %1361 = vmatprep.subr.bf16.mxu1 %v574_v41  ;;  %v827_v47 = vmul.bf16 %v824_v45, %v268_v21  ;;  %v826_v53 = vmul.bf16 %v821_v49, %v268_v21 }
  0xc4   : > { %1368 = vmatpush3.bf16.msra.mxu0 %v1502_v36  ;;  %1371 = vmatprep.mubr.msk.bf16.mxu0 %vm343_vm0, %v1506_v42 }
  0xc5   : > { %1369 = vmatprep.subr.bf16.mxu0 %v1503_v43 }
  0xc6   : > { %1362 = vmatpush3.bf16.msra.mxu1 %v574_v41 }
  0xc7   : > { %1375 = vmatprep.subr.bf16.mxu1 %v1841_v5 }
  0xc8   : > { %1370 = vmatpush3.bf16.msra.mxu0 %v1503_v43 }
  0xc9   : > { %1364 = vmatmul.mubr.msk.bf16.vlgmr.msra.gmra.mxu1 %vm343_vm0, %v1505_v48  ;;  %1383 = vmatprep.subr.bf16.mxu0 %v827_v47 }
  0xca   : > { %1376 = vmatpush3.bf16.msra.mxu1 %v1841_v5  ;;  %1379 = vmatprep.mubr.msk.bf16.mxu1 %vm343_vm0, %v1508_v50 }
  0xcb   : > { %1372 = vmatmul.mubr.msk.bf16.vlgmr.msra.gmra.mxu0 %vm343_vm0, %v1507_v51  ;;  %1377 = vmatprep.subr.bf16.mxu1 %v1849_v7 }
  0xcc   : > { %1384 = vmatpush3.bf16.msra.mxu0 %v827_v47  ;;  %1387 = vmatprep.mubr.msk.bf16.mxu0 %vm343_vm0, %v1510_v52 }
  0xcd   : > { %1385 = vmatprep.subr.bf16.mxu0 %v826_v53 }
  0xce   : > { %1378 = vmatpush3.bf16.msra.mxu1 %v1849_v7  ;;  %v1066_v34 = vpop.permute.xlu1 %1065  ;;  %v1061_v49 = vpop.permute.xlu0 %1060 }
  0xcf   : > { %1391 = vmatprep.subr.bf16.mxu1 %v1823_v0 }
  0xd0   : > { %1386 = vmatpush3.bf16.msra.mxu0 %v826_v53 }
  0xd1   : > { %1380 = vmatmul.mubr.msk.bf16.vlgmr.msra.gmra.mxu1 %vm343_vm0, %v1509_v54  ;;  %1399 = vmatprep.subr.bf16.mxu0 %v1831_v2 }
  0xd2   : > { %1392 = vmatpush3.bf16.msra.mxu1 %v1823_v0  ;;  %1395 = vmatprep.mubr.msk.bf16.mxu1 %vm343_vm0, %v1512_v55  ;;  %v1071_v50 = vpop.permute.xlu1 %1070 }
  0xd3   : > { %1388 = vmatmul.mubr.msk.bf16.vlgmr.msra.gmra.mxu0 %vm343_vm0, %v1511_v56  ;;  %1393 = vmatprep.subr.bf16.mxu1 %v1826_v1 }
  0xd4   : > { %1400 = vmatpush3.bf16.msra.mxu0 %v1831_v2  ;;  %1403 = vmatprep.mubr.msk.bf16.mxu0 %vm343_vm0, %v1514_v57 }
  0xd5   : > { %1401 = vmatprep.subr.bf16.mxu0 %v1836_v3 }
  0xd6   : > { %1394 = vmatpush3.bf16.msra.mxu1 %v1826_v1 }
  0xd8   : > { %1402 = vmatpush3.bf16.msra.mxu0 %v1836_v3 }
  0xd9   : > { %1396 = vmatmul.mubr.msk.bf16.vlgmr.msra.gmra.mxu1 %vm343_vm0, %v1513_v58 }
  0xdb   : > { %1404 = vmatmul.mubr.msk.bf16.vlgmr.msra.gmra.mxu0 %vm343_vm0, %v1515_v59 }
 0x17a   : > { %v1341_v60 = vpop.f32.mrf.mxu0 }
 0x17c   : > { %v384_v61 = vpop.f32.mrf.mxu0 }
 0x17e   : > { %v1342_v62 = vpop.f32.mrf.mxu0 }
 0x180   : > { %v387_v63 = vpop.f32.mrf.mxu0 }
 0x181   : > { %v1349_v0 = vpop.f32.mrf.mxu1 }
 0x182   : > { %v458_v9 = vadd.f32 %v1349_v0, %v1341_v60 }
 0x183   : > { %v1357_v2 = vpop.f32.mrf.mxu0  ;;  %v449_v4 = vpop.f32.mrf.mxu1 }
 0x184   : > { %v450_v11 = vadd.f32 %v449_v4, %v384_v61  ;;  %v546_v13 = vadd.f32 %v1357_v2, %v458_v9 }
 0x185   : > { %v529_v5 = vpop.f32.mrf.mxu0  ;;  %v1350_v6 = vpop.f32.mrf.mxu1 }
 0x186   : > { %v461_v14 = vadd.f32 %v1350_v6, %v1342_v62  ;;  %v544_v17 = vadd.f32 %v529_v5, %v450_v11  ;;  %v1076_v5 = vpop.permute.xlu0 %1075 }
 0x187   : > { %v1358_v7 = vpop.f32.mrf.mxu0  ;;  %v452_v8 = vpop.f32.mrf.mxu1 }
 0x188   : > { %v453_v18 = vadd.f32 %v452_v8, %v387_v63  ;;  %v547_v22 = vadd.f32 %v1358_v7, %v461_v14 }
 0x189   : > { %v532_v1 = vpop.f32.mrf.mxu0  ;;  %v1365_v10 = vpop.f32.mrf.mxu1 }
 0x18a   : > { %v648_v19 = vadd.f32 %v1365_v10, %v546_v13  ;;  %v545_v26 = vadd.f32 %v532_v1, %v453_v18 }
 0x18b   : > { %v1373_v3 = vpop.f32.mrf.mxu0  ;;  %v631_v12 = vpop.f32.mrf.mxu1 }
 0x18c   : > { %v646_v23 = vadd.f32 %v631_v12, %v544_v17  ;;  %v738_v27 = vadd.f32 %v1373_v3, %v648_v19 }
 0x18d   : > { %v721_v15 = vpop.f32.mrf.mxu0  ;;  %v1366_v16 = vpop.f32.mrf.mxu1 }
 0x18e   : > { %v649_v28 = vadd.f32 %v1366_v16, %v547_v22  ;;  %v736_v31 = vadd.f32 %v721_v15, %v646_v23 }
 0x18f   : > { %v1374_v20 = vpop.f32.mrf.mxu0  ;;  %v634_v21 = vpop.f32.mrf.mxu1 }
 0x190   : > { %v647_v32 = vadd.f32 %v634_v21, %v545_v26  ;;  %v739_v37 = vadd.f32 %v1374_v20, %v649_v28 }
 0x191   : > { %v724_v24 = vpop.f32.mrf.mxu0  ;;  %v1381_v25 = vpop.f32.mrf.mxu1 }
 0x192   : > { %v814_v33 = vadd.f32 %v1381_v25, %v738_v27  ;;  %v737_v41 = vadd.f32 %v724_v24, %v647_v32 }
 0x193   : > { %v1389_v29 = vpop.f32.mrf.mxu0  ;;  %v797_v30 = vpop.f32.mrf.mxu1 }
 0x194   : > { %v812_v38 = vadd.f32 %v797_v30, %v736_v31  ;;  %v900_v42 = vadd.f32 %v1389_v29, %v814_v33 }
 0x195   : > { %v883_v35 = vpop.f32.mrf.mxu0  ;;  %v1382_v36 = vpop.f32.mrf.mxu1 }
 0x196   : > { %v815_v43 = vadd.f32 %v1382_v36, %v739_v37  ;;  %v898_v46 = vadd.f32 %v883_v35, %v812_v38 }
 0x197   : > { %v1390_v39 = vpop.f32.mrf.mxu0  ;;  %v800_v40 = vpop.f32.mrf.mxu1 }
 0x198   : > { %v813_v47 = vadd.f32 %v800_v40, %v737_v41  ;;  %v901_v53 = vadd.f32 %v1390_v39, %v815_v43 }
 0x199   : > { %v886_v44 = vpop.f32.mrf.mxu0  ;;  %v1397_v45 = vpop.f32.mrf.mxu1 }
 0x19a   : > { %v976_v48 = vadd.f32 %v1397_v45, %v900_v42  ;;  %v899_v58 = vadd.f32 %v886_v44, %v813_v47 }
 0x19b   : > { %v1405_v51 = vpop.f32.mrf.mxu0  ;;  %v959_v52 = vpop.f32.mrf.mxu1 }
 0x19c   : > { %v1052_v54 = vadd.f32 %v1405_v51, %v976_v48  ;;  %v974_v55 = vadd.f32 %v959_v52, %v898_v46 }
 0x19d   : > { %v1035_v56 = vpop.f32.mrf.mxu0  ;;  %v1398_v57 = vpop.f32.mrf.mxu1 }
 0x19e   : > { %v1050_v59 = vadd.f32 %v1035_v56, %v974_v55  ;;  %v977_v60 = vadd.f32 %v1398_v57, %v901_v53  ;;  %v1080_v61 = vadd.f32 %v1071_v50, %v1052_v54 }
 0x19f   : > { %v1406_v62 = vpop.f32.mrf.mxu0  ;;  %v962_v63 = vpop.f32.mrf.mxu1 }
 0x1a0   : > { %v1078_v0 = vadd.f32 %v1061_v49, %v1050_v59  ;;  %1085 = vst.msk [vmem:[%s241_s18 + $0x10] sm:$0xff] %vm1082_vm6, %v1080_v61  ;;  %v1053_v2 = vadd.f32 %v1406_v62, %v977_v60  ;;  %v975_v4 = vadd.f32 %v962_v63, %v899_v58 }
 0x1a1   : > { %v1038_v6 = vpop.f32.mrf.mxu0 }
 0x1a2   : > { %1083 = vst.msk [vmem:[%s241_s18] sm:$0xff] %vm1082_vm6, %v1078_v0  ;;  %v1081_v7 = vadd.f32 %v1076_v5, %v1053_v2  ;;  %v1051_v8 = vadd.f32 %v1038_v6, %v975_v4 }
 0x1a4   : > { %1086 = vst.msk [vmem:[%s241_s18 + $0x18] sm:$0xff] %vm1082_vm6, %v1081_v7  ;;  %v1079_v9 = vadd.f32 %v1066_v34, %v1051_v8 }
 0x1a6   : > { %1084 = vst.msk [vmem:[%s241_s18 + $0x8] sm:$0xff] %vm1082_vm6, %v1079_v9 }
 0x1a7   : > { %1583 = shalt.err (!%p1580_p5)
}
 0x1a8   : > { %s1584_s21 = scalar_lea.hbm %s1932_s22, 512  ;;  %s1588_s25 = scalar_lea.hbm %s1985_s3, 1024 }
 0x1a9   : > { %p1585_p7 = scmp.ne.s32.totalorder %s1932_s22, %s1584_s21  ;;  %p1589_p9 = scmp.lt.s32.totalorder %s1932_s22, %s1985_s3 }
 0x1aa   : > { %p1590_p11 = scmp.lt.s32.totalorder %s1588_s25, %s1584_s21 }
 0x1ab   : > { %p1586_p4 = pnand %p1585_p7, %p1777_p13 }
 0x1ac   : > { %p1591_p10 = por %p1590_p11, %p1589_p9 }
 0x1ad   : > { %p1587_p6 = pneg %p1586_p4 }
 0x1af   : > { %p1592_p1 = pnand %p1591_p10, %p1587_p6 }
 0x1b1   : > { %1595 = shalt.err (!%p1592_p1)
}
 0x1b2   : > { %s1666_s26 = smov 128  }
 0x1b3   : > { %1413 = dma.vmem_to_hbm [thread:$0]  (%p1777_p13), %s1926_s4, 512, %s1932_s22, %s1088_s15, %s1666_s26, %s1666_s26, %s1660_s24  }
 0x1b4 PF: > { %s1118_s27 = sand.u32 1, %s1634_s12   ;;  %p2003_p8 = scmp.ne.s32.totalorder %s1992_s23, 0 }
 0x1b5   : > { %p2004_p12 = scmp.ge.s32.totalorder %s1654_s17, 2  ;;  %s1119_s20 = scalar_lea.sflag [#allocation4], %s1118_s27 }
 0x1b7   : > { %p1424_p0 = pnand %p2004_p12, %p2003_p8 }
 0x1b9   : > { %p1425_p2 = pneg %p1424_p0 }
 0x1bb   : > { %1629 = dma.done.wait (%p1425_p2), %s1119_s20, 512  }
 0x1bc   : > { %1631 = vsyncadd (%p1425_p2), %s1119_s20, 4294966784  ;;  %s20_s17 = sadd.s32 1, %s1654_s17   ;;  %s2005_s12 = smov %s1638_s13 }
 0x1bd   : > { %p17_p3 = scmp.ge.s32.totalorder %s20_s17, 4   ;;  %s2006_s13 = smov %s1642_s14 }
 0x1be   : > { %s2007_s14 = smov %s1786_s19  ;;  %s2008_s15 = smov %s1650_s16 }
 0x1bf   : > { %s2009_s16 = smov %s2011_s28  ;;  %19 = sbr.rel (!%p17_p3) target bundleno = 7 (0x7), region = 96 }
 0x1c4   :  { %1124 = vsyncpa [#allocation3], 1 }
 0x1c5   :  { %1126 = vsyncpa [#allocation3 + $0x1], 1 }
 0x1c6   :  { %1127 = vsyncpa [#allocation6], 1 }
 0x1c7   :  { %1128 = vsyncpa [#allocation4], 1 }
 0x1c8   :  { %1130 = vsyncpa [#allocation4 + $0x1], 1 }

</bundles_post_ra>
